<compile_context>
chip_gen: v7x
topology: tpu7x:2x2x1
jax: 0.10.0
libtpu: 0.0.40
codegen_flags: <defaults>
</compile_context>

<pallas_src>
import functools

import jax
import jax.numpy as jnp
from jax.experimental import pallas as pl
from jax.experimental.pallas import tpu as pltpu


def _round_up(x, m):
    return (x + m - 1) // m * m


# ----------------------------- Pallas kernel -------------------------------
def fused_mention_kernel(s_ref, e_ref, enc_ref, w1s_ref, w1e_ref, tw_ref,
                         b1_ref, w2_ref, b2_ref, out_ref,
                         *, max_width, mxu_dtype):
    """One row tile of candidate spans.

    In-kernel gather (one-hot matmul) of the span endpoints and the folded
    width table, then the fused 2-layer MLP.  The embedding concat, the
    doc-type embedding and the width-score broadcast are all pre-folded into
    the weights/bias, so the body is just matmuls + bias + ReLU.
    """
    s = s_ref[...]                                    # (tm, 1) int32
    e = e_ref[...]                                    # (tm, 1) int32
    w = jnp.clip(e - s, 0, max_width - 1)             # span-width index

    tm = out_ref.shape[0]
    n_words = enc_ref.shape[0]
    n_width = tw_ref.shape[0]

    # One-hot gathers (exact: 0/1 times bf16 values).
    word_iota = jax.lax.broadcasted_iota(jnp.int32, (tm, n_words), 1)
    width_iota = jax.lax.broadcasted_iota(jnp.int32, (tm, n_width), 1)
    oh_s = jnp.where(word_iota == s, 1.0, 0.0).astype(mxu_dtype)    # (tm, n_words)
    oh_e = jnp.where(word_iota == e, 1.0, 0.0).astype(mxu_dtype)
    oh_w = jnp.where(width_iota == w, 1.0, 0.0).astype(mxu_dtype)   # (tm, n_width)

    enc = enc_ref[...]                                # (n_words, hsize) bf16
    enc_s = jnp.dot(oh_s, enc, preferred_element_type=jnp.float32).astype(mxu_dtype)
    enc_e = jnp.dot(oh_e, enc, preferred_element_type=jnp.float32).astype(mxu_dtype)

    # Layer 1 (MXU, f32 accumulation): start/end endpoint blocks + width table
    # (which already contains BOTH the mention-MLP and width-prior-MLP rows),
    # bias carries b1 | bp1 plus the folded doc-type contribution.
    h = jnp.dot(enc_s, w1s_ref[...], preferred_element_type=jnp.float32)
    h = h + jnp.dot(enc_e, w1e_ref[...], preferred_element_type=jnp.float32)
    h = h + jnp.dot(oh_w, tw_ref[...], preferred_element_type=jnp.float32)
    h = jnp.maximum(h + b1_ref[...], 0.0)

    # Layer 2: width-score broadcast + bp2 are folded into W2/b2.
    out = jnp.dot(h.astype(mxu_dtype), w2_ref[...],
                  preferred_element_type=jnp.float32)
    out_ref[...] = (out + b2_ref[...]).astype(out_ref.dtype)        # bf16 writeback


# ----------------------- wrapper: weight packing + call ---------------------
def pack_mention_params(params, span_width_emb, span_width_prior_emb,
                        doc_type_emb, *, hsize, emb_size, max_span_width,
                        mxu_dtype=jnp.bfloat16):
    """Pack mention_mlp + span_width_mlp (and the width / doc-type embedding
    tables) into one padded 2-layer MLP consumed by the kernel."""
    w1, b1 = params["w1"], params["b1"]          # (D_in, H), (1, H)
    w2, b2 = params["w2"], params["b2"]          # (H, C),   (1, C)
    wp1, bp1 = params["wp1"], params["bp1"]      # (emb, H), (1, H)
    wp2, bp2 = params["wp2"], params["bp2"]      # (H, 1),   (1, 1)

    H = w1.shape[1]
    C = w2.shape[1]
    hl = _round_up(H, 128)                       # left (mention) hidden block
    h_pad = 2 * hl                               # [mention | width-prior] hidden
    c_pad = _round_up(max(C, 128), 128)          # lane-dense output
    wt_pad = _round_up(max_span_width, 8)

    # Span-emb concat order in the module: [start | end | width | doc_type].
    w1_s = w1[:hsize]
    w1_e = w1[hsize:2 * hsize]
    w1_w = w1[2 * hsize:2 * hsize + emb_size]
    w1_d = w1[2 * hsize + emb_size:2 * hsize + 2 * emb_size]

    w1s_cat = jnp.zeros((hsize, h_pad), jnp.float32).at[:, :H].set(w1_s)
    w1e_cat = jnp.zeros((hsize, h_pad), jnp.float32).at[:, :H].set(w1_e)

    # Fold BOTH width-embedding lookups + their first-layer weights into one table.
    t_width = jnp.zeros((wt_pad, h_pad), jnp.float32)
    t_width = t_width.at[:max_span_width, :H].set(span_width_emb @ w1_w)
    t_width = t_width.at[:max_span_width, hl:hl + H].set(span_width_prior_emb @ wp1)

    b1_base = jnp.zeros((1, h_pad), jnp.float32)
    b1_base = b1_base.at[:, :H].set(b1)
    b1_base = b1_base.at[:, hl:hl + H].set(bp1)

    # Doc-type embedding contribution (constant per document) folded into b1.
    doc_contrib = doc_type_emb @ w1_d            # (n_doc_types, H)

    w2_cat = jnp.zeros((h_pad, c_pad), jnp.float32)
    w2_cat = w2_cat.at[:H, :C].set(w2)
    # width_score (N,1) broadcast over C  ==  width_hidden @ (wp2 * ones(1,C))
    w2_cat = w2_cat.at[hl:hl + H, :C].set(jnp.broadcast_to(wp2, (H, C)))
    b2_cat = jnp.zeros((1, c_pad), jnp.float32).at[:, :C].set(b2 + bp2)

    return {
        "w1s": w1s_cat.astype(mxu_dtype), "w1e": w1e_cat.astype(mxu_dtype),
        "t_width": t_width.astype(mxu_dtype), "w2": w2_cat.astype(mxu_dtype),
        "b1_base": b1_base, "b2": b2_cat, "doc_contrib": doc_contrib,
        "H": H, "C": C, "hl": hl, "h_pad": h_pad, "c_pad": c_pad,
        "wt_pad": wt_pad, "hsize": hsize, "max_span_width": max_span_width,
        "mxu_dtype": mxu_dtype,
    }


def _choose_tm(n, h_pad, c_pad, tm_max=1024, vmem_budget=24 * 1024 * 1024):
    """Row-tile size: target >=2 grid steps (v7x megacore sharding via
    dimension_semantics=('parallel',)), cap at tm_max for v5e/v6e step-overhead
    amortization, and shrink to fit the per-step VMEM working set (matters at
    production mlp_size=1000 -> h_pad=2048 on v7x's 64 MiB VMEM)."""
    tm = min(tm_max, _round_up(max(-(-n // 2), 8), 8))
    while tm > 8:
        # Rough per-step live bytes: f32 hidden + bf16 hidden copy + one-hots
        # + double-buffered (lane-padded) index tiles and bf16 output tiles.
        act_bytes = tm * h_pad * (4 + 2) + 3 * tm * 128 * 2
        io_bytes = 2 * (2 * tm * 128 * 4 + tm * c_pad * 2)
        if act_bytes + io_bytes <= vmem_budget:
            break
        tm = max(8, _round_up(tm // 2, 8))
    return tm


def mention_logits_pallas(encoded_doc, starts, ends, doc_type, packed, *, tm_max=1024):
    """Returns the PADDED (n_pad, c_pad) bf16 logits buffer; valid data is
    [:N, :C].  Downstream consumers (top-k / loss) can read it directly —
    slicing is left to the caller to avoid an extra HBM pass here."""
    N = starts.shape[0]
    num_words, hsize = encoded_doc.shape
    h_pad, c_pad, wt_pad = packed["h_pad"], packed["c_pad"], packed["wt_pad"]
    mxu_dtype = packed["mxu_dtype"]

    tm = _choose_tm(N, h_pad, c_pad, tm_max)
    n_pad = _round_up(N, tm)
    grid = (n_pad // tm,)

    # Tiny per-call prep (no N x D passes): pad the doc, pad the index columns,
    # fold the doc-type embedding into the layer-1 bias.
    wp = _round_up(num_words, 8)
    enc = jnp.zeros((wp, hsize), mxu_dtype).at[:num_words].set(
        encoded_doc.astype(mxu_dtype))
    s_col = jnp.zeros((n_pad, 1), jnp.int32).at[:N, 0].set(starts.astype(jnp.int32))
    e_col = jnp.zeros((n_pad, 1), jnp.int32).at[:N, 0].set(ends.astype(jnp.int32))
    b1_eff = packed["b1_base"].at[0, :packed["H"]].add(packed["doc_contrib"][doc_type])

    row = lambda i: (i, 0)
    whole = lambda i: (0, 0)   # constant block index -> fetched once, kept resident

    kernel = functools.partial(fused_mention_kernel,
                               max_width=packed["max_span_width"],
                               mxu_dtype=mxu_dtype)

    out = pl.pallas_call(
        kernel,
        out_shape=jax.ShapeDtypeStruct((n_pad, c_pad), mxu_dtype),   # bf16 writeback
        grid=grid,
        in_specs=[
            pl.BlockSpec((tm, 1), row),             # span starts (int32)
            pl.BlockSpec((tm, 1), row),             # span ends   (int32)
            pl.BlockSpec((wp, hsize), whole),       # encoded doc (bf16)
            pl.BlockSpec((hsize, h_pad), whole),    # W1 start-endpoint block
            pl.BlockSpec((hsize, h_pad), whole),    # W1 end-endpoint block
            pl.BlockSpec((wt_pad, h_pad), whole),   # folded width table (both MLPs)
            pl.BlockSpec((1, h_pad), whole),        # b1 | bp1 (+ doc-type fold)
            pl.BlockSpec((h_pad, c_pad), whole),    # W2 (width-score broadcast folded)
            pl.BlockSpec((1, c_pad), whole),        # b2 + bp2
        ],
        out_specs=pl.BlockSpec((tm, c_pad), row),
        compiler_params=pltpu.CompilerParams(
            dimension_semantics=("parallel",),      # >=2 steps -> both v7x TCs busy
            vmem_limit_bytes=32 * 1024 * 1024,      # matches _choose_tm budget + headroom
        ),
        # NOTE: at production mlp_size the constant-index weight blocks could be
        # single-buffered (pipeline_mode=pl.Buffered(1)) to save VMEM; at these
        # sizes the double buffers are negligible, so we keep the default.
    )(s_col, e_col, enc, packed["w1s"], packed["w1e"], packed["t_width"],
      b1_eff, packed["w2"], packed["b2"])

    return out


# ------------------------------- reference -----------------------------------
def reference_logits(encoded_doc, starts, ends, doc_type, params,
                     span_width_emb, span_width_prior_emb, doc_type_emb):
    """Pure-JAX f32 re-implementation of get_mention_logits_and_loss (eval path)."""
    start_emb = encoded_doc[starts, :]
    end_emb = encoded_doc[ends, :]
    w = ends - starts
    width_embs = span_width_emb[w]
    d_emb = jnp.broadcast_to(doc_type_emb[doc_type][None, :],
                             (starts.shape[0], doc_type_emb.shape[1]))
    span = jnp.concatenate([start_emb, end_emb, width_embs, d_emb], axis=-1)
    h = jnp.maximum(span @ params["w1"] + params["b1"], 0.0)
    logits = h @ params["w2"] + params["b2"]
    hw = jnp.maximum(span_width_prior_emb[w] @ params["wp1"] + params["bp1"], 0.0)
    width_scores = hw @ params["wp2"] + params["bp2"]
    return logits + width_scores


# --------------------------------- main --------------------------------------
if __name__ == "__main__":
    key = jax.random.PRNGKey(0)

    # Small, module-consistent sizes.
    num_words = 64          # document length (in subtokens)
    hsize = 32              # doc encoder hidden size
    emb_size = 20           # module default
    max_span_width = 20     # module default
    mlp_size = 128          # mlp_size (scaled down from 1000)
    n_event_subtypes = 8    # len(EVENT_SUBTYPES), scaled down
    n_doc_types = 4         # len(DOC_TYPES_TO_IDX), scaled down
    N = 500                 # ragged candidate-span count (tests row padding)

    d_in = 2 * hsize + 2 * emb_size  # endpoint ment_emb => factor 2

    keys = jax.random.split(key, 12)
    encoded_doc = jax.random.normal(keys[0], (num_words, hsize), jnp.float32)

    # Embedding tables (deterministic init).
    span_width_emb = jax.random.normal(keys[1], (max_span_width, emb_size), jnp.float32) * 0.1
    span_width_prior_emb = jax.random.normal(keys[2], (max_span_width, emb_size), jnp.float32) * 0.1
    doc_type_emb = jax.random.normal(keys[3], (n_doc_types, emb_size), jnp.float32) * 0.1

    # MLP parameters (eval mode: dropout is identity).
    params = {
        "w1": jax.random.normal(keys[4], (d_in, mlp_size), jnp.float32) * 0.05,
        "b1": jax.random.normal(keys[5], (1, mlp_size), jnp.float32) * 0.05,
        "w2": jax.random.normal(keys[6], (mlp_size, n_event_subtypes), jnp.float32) * 0.05,
        "b2": jax.random.normal(keys[7], (1, n_event_subtypes), jnp.float32) * 0.05,
        "wp1": jax.random.normal(keys[8], (emb_size, mlp_size), jnp.float32) * 0.05,
        "bp1": jax.random.normal(keys[9], (1, mlp_size), jnp.float32) * 0.05,
        "wp2": jax.random.normal(keys[10], (mlp_size, 1), jnp.float32) * 0.05,
        "bp2": jax.random.normal(keys[11], (1, 1), jnp.float32) * 0.05,
    }

    # Candidate span endpoints (deterministic): start in [0, num_words),
    # width in [0, max_span_width), clipped so end < num_words.
    starts = jnp.arange(N, dtype=jnp.int32) % num_words
    widths = (jnp.arange(N, dtype=jnp.int32) * 3) % max_span_width
    ends = jnp.minimum(starts + widths, num_words - 1)
    doc_type = 1

    # Pack both MLPs + embedding tables once; run the fully fused kernel.
    packed = pack_mention_params(
        params, span_width_emb, span_width_prior_emb, doc_type_emb,
        hsize=hsize, emb_size=emb_size, max_span_width=max_span_width,
        mxu_dtype=jnp.bfloat16)
    logits_padded = mention_logits_pallas(encoded_doc, starts, ends, doc_type, packed)
    logits_padded = jax.block_until_ready(logits_padded)

    # Slice only for the correctness check (a real consumer could read the
    # padded bf16 buffer directly).
    logits = logits_padded[:N, :n_event_subtypes].astype(jnp.float32)

    # Sanity check against pure-JAX f32 reference (loose tol: bf16 MXU operands
    # and bf16 output).
    ref = reference_logits(encoded_doc, starts, ends, doc_type, params,
                           span_width_emb, span_width_prior_emb, doc_type_emb)
    assert logits.shape == (N, n_event_subtypes)
    assert jnp.allclose(logits, ref, atol=3e-2, rtol=3e-2), \
        float(jnp.max(jnp.abs(logits - ref)))

    # TODO(synk): doc encoder, top-k span selection, gold-mention construction
    # and the BCE mention loss are data-dependent / training-only paths, kept
    # outside the kernel.
    print("KERNEL_OK")
</pallas_src>

<mosaic_0001>
module attributes {stable_mosaic.version = 11 : i64} {
  func.func @fused_mention_kernel(%arg0: i32, %arg1: memref<256x1xi32, #tpu.memory_space<vmem>>, %arg2: memref<256x1xi32, #tpu.memory_space<vmem>>, %arg3: memref<64x32xbf16, #tpu.memory_space<vmem>>, %arg4: memref<32x256xbf16, #tpu.memory_space<vmem>>, %arg5: memref<32x256xbf16, #tpu.memory_space<vmem>>, %arg6: memref<24x256xbf16, #tpu.memory_space<vmem>>, %arg7: memref<1x256xf32, #tpu.memory_space<vmem>>, %arg8: memref<256x128xbf16, #tpu.memory_space<vmem>>, %arg9: memref<1x128xf32, #tpu.memory_space<vmem>>, %arg10: memref<256x128xbf16, #tpu.memory_space<vmem>>) attributes {dimension_semantics = [#tpu.dimension_semantics<parallel>], iteration_bounds = array<i64: 2>, scalar_prefetch = 0 : i64, scratch_operands = 0 : i64, tpu.core_type = #tpu.core_type<tc>, window_params = [{transform_indices = @transform_0, window_bounds = array<i64: 256, 1>}, {transform_indices = @transform_1, window_bounds = array<i64: 256, 1>}, {pipeline_mode = #tpu.pipeline_mode<synchronous>, transform_indices = @transform_2, window_bounds = array<i64: 64, 32>}, {pipeline_mode = #tpu.pipeline_mode<synchronous>, transform_indices = @transform_3, window_bounds = array<i64: 32, 256>}, {pipeline_mode = #tpu.pipeline_mode<synchronous>, transform_indices = @transform_4, window_bounds = array<i64: 32, 256>}, {pipeline_mode = #tpu.pipeline_mode<synchronous>, transform_indices = @transform_5, window_bounds = array<i64: 24, 256>}, {pipeline_mode = #tpu.pipeline_mode<synchronous>, transform_indices = @transform_6, window_bounds = array<i64: 1, 256>}, {pipeline_mode = #tpu.pipeline_mode<synchronous>, transform_indices = @transform_7, window_bounds = array<i64: 256, 128>}, {pipeline_mode = #tpu.pipeline_mode<synchronous>, transform_indices = @transform_8, window_bounds = array<i64: 1, 128>}, {transform_indices = @transform_9, window_bounds = array<i64: 256, 128>}]} {
    %c0 = arith.constant 0 : index
    %c0_0 = arith.constant 0 : index
    %0 = vector.load %arg1[%c0, %c0_0] : memref<256x1xi32, #tpu.memory_space<vmem>>, vector<256x1xi32>
    %c0_1 = arith.constant 0 : index
    %c0_2 = arith.constant 0 : index
    %1 = vector.load %arg2[%c0_1, %c0_2] : memref<256x1xi32, #tpu.memory_space<vmem>>, vector<256x1xi32>
    %2 = arith.subi %1, %0 : vector<256x1xi32>
    %c0_i32 = arith.constant 0 : i32
    %c19_i32 = arith.constant 19 : i32
    %3 = vector.broadcast %c0_i32 : i32 to vector<256x1xi32>
    %4 = arith.maxsi %3, %2 : vector<256x1xi32>
    %5 = vector.broadcast %c19_i32 : i32 to vector<256x1xi32>
    %6 = arith.minsi %5, %4 : vector<256x1xi32>
    %7 = tpu.iota {dimensions = array<i32: 1>} : vector<256x64xi32>
    %8 = tpu.iota {dimensions = array<i32: 1>} : vector<256x24xi32>
    %9 = vector.broadcast %0 : vector<256x1xi32> to vector<256x64xi32>
    %10 = arith.cmpi eq, %7, %9 : vector<256x64xi32>
    %cst = arith.constant 1.000000e+00 : f32
    %cst_3 = arith.constant 0.000000e+00 : f32
    %11 = vector.broadcast %cst : f32 to vector<256x64xf32>
    %12 = vector.broadcast %cst_3 : f32 to vector<256x64xf32>
    %13 = arith.select %10, %11, %12 : vector<256x64xi1>, vector<256x64xf32>
    %14 = arith.truncf %13 : vector<256x64xf32> to vector<256x64xbf16>
    %15 = vector.broadcast %1 : vector<256x1xi32> to vector<256x64xi32>
    %16 = arith.cmpi eq, %7, %15 : vector<256x64xi32>
    %cst_4 = arith.constant 1.000000e+00 : f32
    %cst_5 = arith.constant 0.000000e+00 : f32
    %17 = vector.broadcast %cst_4 : f32 to vector<256x64xf32>
    %18 = vector.broadcast %cst_5 : f32 to vector<256x64xf32>
    %19 = arith.select %16, %17, %18 : vector<256x64xi1>, vector<256x64xf32>
    %20 = arith.truncf %19 : vector<256x64xf32> to vector<256x64xbf16>
    %21 = vector.broadcast %6 : vector<256x1xi32> to vector<256x24xi32>
    %22 = arith.cmpi eq, %8, %21 : vector<256x24xi32>
    %cst_6 = arith.constant 1.000000e+00 : f32
    %cst_7 = arith.constant 0.000000e+00 : f32
    %23 = vector.broadcast %cst_6 : f32 to vector<256x24xf32>
    %24 = vector.broadcast %cst_7 : f32 to vector<256x24xf32>
    %25 = arith.select %22, %23, %24 : vector<256x24xi1>, vector<256x24xf32>
    %26 = arith.truncf %25 : vector<256x24xf32> to vector<256x24xbf16>
    %c0_8 = arith.constant 0 : index
    %c0_9 = arith.constant 0 : index
    %27 = vector.load %arg3[%c0_8, %c0_9] : memref<64x32xbf16, #tpu.memory_space<vmem>>, vector<64x32xbf16>
    %cst_10 = arith.constant dense<0.000000e+00> : vector<256x32xf32>
    %28 = tpu.matmul %14, %27, %cst_10 {dimension_numbers = #tpu.dot_dimension_numbers<[1], [0], [0], [1], [0, 0, 1, 1], [], []>} : vector<256x64xbf16>, vector<64x32xbf16>, vector<256x32xf32> -> vector<256x32xf32>
    %29 = arith.truncf %28 : vector<256x32xf32> to vector<256x32xbf16>
    %cst_11 = arith.constant dense<0.000000e+00> : vector<256x32xf32>
    %30 = tpu.matmul %20, %27, %cst_11 {dimension_numbers = #tpu.dot_dimension_numbers<[1], [0], [0], [1], [0, 0, 1, 1], [], []>} : vector<256x64xbf16>, vector<64x32xbf16>, vector<256x32xf32> -> vector<256x32xf32>
    %31 = arith.truncf %30 : vector<256x32xf32> to vector<256x32xbf16>
    %c0_12 = arith.constant 0 : index
    %c0_13 = arith.constant 0 : index
    %32 = vector.load %arg4[%c0_12, %c0_13] : memref<32x256xbf16, #tpu.memory_space<vmem>>, vector<32x256xbf16>
    %cst_14 = arith.constant dense<0.000000e+00> : vector<256x256xf32>
    %33 = tpu.matmul %29, %32, %cst_14 {dimension_numbers = #tpu.dot_dimension_numbers<[1], [0], [0], [1], [0, 0, 1, 1], [], []>} : vector<256x32xbf16>, vector<32x256xbf16>, vector<256x256xf32> -> vector<256x256xf32>
    %c0_15 = arith.constant 0 : index
    %c0_16 = arith.constant 0 : index
    %34 = vector.load %arg5[%c0_15, %c0_16] : memref<32x256xbf16, #tpu.memory_space<vmem>>, vector<32x256xbf16>
    %cst_17 = arith.constant dense<0.000000e+00> : vector<256x256xf32>
    %35 = tpu.matmul %31, %34, %cst_17 {dimension_numbers = #tpu.dot_dimension_numbers<[1], [0], [0], [1], [0, 0, 1, 1], [], []>} : vector<256x32xbf16>, vector<32x256xbf16>, vector<256x256xf32> -> vector<256x256xf32>
    %36 = arith.addf %33, %35 : vector<256x256xf32>
    %c0_18 = arith.constant 0 : index
    %c0_19 = arith.constant 0 : index
    %37 = vector.load %arg6[%c0_18, %c0_19] : memref<24x256xbf16, #tpu.memory_space<vmem>>, vector<24x256xbf16>
    %cst_20 = arith.constant dense<0.000000e+00> : vector<256x256xf32>
    %38 = tpu.matmul %26, %37, %cst_20 {dimension_numbers = #tpu.dot_dimension_numbers<[1], [0], [0], [1], [0, 0, 1, 1], [], []>} : vector<256x24xbf16>, vector<24x256xbf16>, vector<256x256xf32> -> vector<256x256xf32>
    %39 = arith.addf %36, %38 : vector<256x256xf32>
    %c0_21 = arith.constant 0 : index
    %c0_22 = arith.constant 0 : index
    %40 = vector.load %arg7[%c0_21, %c0_22] : memref<1x256xf32, #tpu.memory_space<vmem>>, vector<1x256xf32>
    %41 = vector.broadcast %40 : vector<1x256xf32> to vector<256x256xf32>
    %42 = arith.addf %39, %41 : vector<256x256xf32>
    %cst_23 = arith.constant 0.000000e+00 : f32
    %43 = vector.broadcast %cst_23 : f32 to vector<256x256xf32>
    %44 = arith.maximumf %42, %43 : vector<256x256xf32>
    %45 = arith.truncf %44 : vector<256x256xf32> to vector<256x256xbf16>
    %c0_24 = arith.constant 0 : index
    %c0_25 = arith.constant 0 : index
    %46 = vector.load %arg8[%c0_24, %c0_25] : memref<256x128xbf16, #tpu.memory_space<vmem>>, vector<256x128xbf16>
    %cst_26 = arith.constant dense<0.000000e+00> : vector<256x128xf32>
    %47 = tpu.matmul %45, %46, %cst_26 {dimension_numbers = #tpu.dot_dimension_numbers<[1], [0], [0], [1], [0, 0, 1, 1], [], []>} : vector<256x256xbf16>, vector<256x128xbf16>, vector<256x128xf32> -> vector<256x128xf32>
    %c0_27 = arith.constant 0 : index
    %c0_28 = arith.constant 0 : index
    %48 = vector.load %arg9[%c0_27, %c0_28] : memref<1x128xf32, #tpu.memory_space<vmem>>, vector<1x128xf32>
    %49 = vector.broadcast %48 : vector<1x128xf32> to vector<256x128xf32>
    %50 = arith.addf %47, %49 : vector<256x128xf32>
    %51 = arith.truncf %50 : vector<256x128xf32> to vector<256x128xbf16>
    %c0_29 = arith.constant 0 : index
    %c0_30 = arith.constant 0 : index
    %52 = vector.load %arg10[%c0_29, %c0_30] : memref<256x128xbf16, #tpu.memory_space<vmem>>, vector<256x128xbf16>
    tpu.vector_store %arg10[%c0_29, %c0_30], %51 {strides = array<i32>} : memref<256x128xbf16, #tpu.memory_space<vmem>>, vector<256x128xbf16>,
    return
  }
  func.func @transform_0(%arg0: i32) -> (i32, i32) {
    %c0_i32 = arith.constant 0 : i32
    %c0_i32_0 = arith.constant 0 : i32
    return %arg0, %c0_i32 : i32, i32
  }
  func.func @transform_1(%arg0: i32) -> (i32, i32) {
    %c0_i32 = arith.constant 0 : i32
    %c0_i32_0 = arith.constant 0 : i32
    return %arg0, %c0_i32 : i32, i32
  }
  func.func @transform_2(%arg0: i32) -> (i32, i32) {
    %c0_i32 = arith.constant 0 : i32
    %c0_i32_0 = arith.constant 0 : i32
    %c0_i32_1 = arith.constant 0 : i32
    return %c0_i32, %c0_i32_0 : i32, i32
  }
  func.func @transform_3(%arg0: i32) -> (i32, i32) {
    %c0_i32 = arith.constant 0 : i32
    %c0_i32_0 = arith.constant 0 : i32
    %c0_i32_1 = arith.constant 0 : i32
    return %c0_i32, %c0_i32_0 : i32, i32
  }
  func.func @transform_4(%arg0: i32) -> (i32, i32) {
    %c0_i32 = arith.constant 0 : i32
    %c0_i32_0 = arith.constant 0 : i32
    %c0_i32_1 = arith.constant 0 : i32
    return %c0_i32, %c0_i32_0 : i32, i32
  }
  func.func @transform_5(%arg0: i32) -> (i32, i32) {
    %c0_i32 = arith.constant 0 : i32
    %c0_i32_0 = arith.constant 0 : i32
    %c0_i32_1 = arith.constant 0 : i32
    return %c0_i32, %c0_i32_0 : i32, i32
  }
  func.func @transform_6(%arg0: i32) -> (i32, i32) {
    %c0_i32 = arith.constant 0 : i32
    %c0_i32_0 = arith.constant 0 : i32
    %c0_i32_1 = arith.constant 0 : i32
    return %c0_i32, %c0_i32_0 : i32, i32
  }
  func.func @transform_7(%arg0: i32) -> (i32, i32) {
    %c0_i32 = arith.constant 0 : i32
    %c0_i32_0 = arith.constant 0 : i32
    %c0_i32_1 = arith.constant 0 : i32
    return %c0_i32, %c0_i32_0 : i32, i32
  }
  func.func @transform_8(%arg0: i32) -> (i32, i32) {
    %c0_i32 = arith.constant 0 : i32
    %c0_i32_0 = arith.constant 0 : i32
    %c0_i32_1 = arith.constant 0 : i32
    return %c0_i32, %c0_i32_0 : i32, i32
  }
  func.func @transform_9(%arg0: i32) -> (i32, i32) {
    %c0_i32 = arith.constant 0 : i32
    %c0_i32_0 = arith.constant 0 : i32
    return %arg0, %c0_i32 : i32, i32
  }
}

</mosaic_0001>

<bundles_post_ra>
// kernel: tpu_custom_call.1
= control target key start
LH: loop header
LB: loop body
LE: loop exit
PB: predicated region body
PF: predicated region fallthrough
CT: control target
= control target key end

     0   :  { %14 = vsyncpa [#allocation3], 0  ;;  %s5339_s0 = inlined_call_operand.vmem [shape: s32[512,1], index: 0, kind: input, shape index: {}]   ;;  %s5340_s1 = inlined_call_operand.vmem [shape: s32[512,1], index: 1, kind: input, shape index: {}]   ;;  %s5341_s2 = inlined_call_operand.vmem [shape: bf16[64,32], index: 2, kind: input, shape index: {}]   ;;  %s5342_s3 = inlined_call_operand.vmem [shape: bf16[32,256], index: 3, kind: input, shape index: {}]   ;;  %s5343_s4 = inlined_call_operand.vmem [shape: bf16[32,256], index: 4, kind: input, shape index: {}]   ;;  %s5344_s5 = inlined_call_operand.vmem [shape: bf16[24,256], index: 5, kind: input, shape index: {}]   ;;  %s5345_s6 = inlined_call_operand.vmem [shape: f32[1,256], index: 6, kind: input, shape index: {}]   ;;  %s5346_s7 = inlined_call_operand.vmem [shape: bf16[256,128], index: 7, kind: input, shape index: {}]   ;;  %s5347_s8 = inlined_call_operand.vmem [shape: f32[1,128], index: 8, kind: input, shape index: {}]   ;;  %s5348_s9 = inlined_call_operand.hbm [shape: bf16[512,128], index: 9, kind: output, shape index: {}]  }
   0x1   :  { %16 = vsyncpa [#allocation3 + $0x1], 0  ;;  %s4021_s30 = smov 0   ;;  %s4023_s10 = smov 0  }
   0x2   :  { %s4025_s11 = smov 0   ;;  %s4027_s12 = smov 0  }
   0x3 LB: > { %s4042_s13 = sadd.s32 4294967295, %s3964_s12   ;;  %s3172_s14 = sadd.s32 4294967294, %s3964_s12   ;;  %s3964_s12 = sphi %s4027_s12, %s5423_s12   ;;  %s3960_s11 = sphi %s4025_s11, %s5422_s11   ;;  %s3956_s10 = sphi %s4023_s10, %s5421_s10   ;;  %s3952_s30 = sphi %s4021_s30, %s5420_s30  }
   0x4   : > { %s4046_s15 = sadd.s32 1, %s3964_s12   ;;  %s228_s16 = sadd.s32 1, %s3960_s11 }
   0x5   : > { %s225_s17 = ssub.s32 %s3964_s12, %s4046_s15  ;;  %p238_p0 = scmp.ne.s32.totalorder %s3960_s11, %s3956_s10 }
   0x6   : > { %p226_p1 = scmp.eq.s32.totalorder %s225_s17, 0  ;;  %p239_p2 = scmp.eq.s32.totalorder %s4042_s13, 1 }
   0x7   : > { %p244_p3 = scmp.ne.s32.totalorder %s3956_s10, %s3952_s30  ;;  %p245_p4 = scmp.eq.s32.totalorder %s3172_s14, 1 }
   0x8   : > { %s4057_s18 = scalar_select %p226_p1, %s3960_s11, %s228_s16  }
   0x9   : > { %p4059_p5 = por %p239_p2, %p238_p0  ;;  %p4063_p6 = por %p245_p4, %p244_p3 }
   0xa   : > { %p3175_p7 = scmp.ge.s32.totalorder %s3964_s12, 1  ;;  %p302_p8 = scmp.lt.s32.totalorder %s3964_s12, 3 }
   0xc   : > { %p303_p9 = pnand %p3175_p7, %p302_p8 }
   0xe   : > { %306 = sbr.rel (%p303_p9) target bundleno = 1091 (0x443), region = 56 }
  0x15   : > { %s3177_s21 = sshll.u32 %s4042_s13, 5  ;;  %v5349_v0 = vmov 0   ;;  %v3865_v1 = vld [vmem:[%s5341_s2] sm:$0xff]   ;;  %v3866_v2 = vld [vmem:[%s5341_s2 + $0x8] sm:$0xff]   ;;  %vm1143_vm15 = vcmask 523264  }
  0x16   : > { %3864 = vset.pattern.permute.xlu1 %v5349_v0  ;;  %3863 = vset.pattern.permute.xlu0 %v5349_v0  ;;  %p344_p10 = scmp.lt.s32.totalorder %s3177_s21, 63 }
  0x17   : > { %3612 = vmatprep.subr.bf16.mxu0 %v3865_v1  ;;  %3652 = vmatprep.subr.bf16.mxu1 %v3865_v1 }
  0x18   : > { %s5425_s21 = smov (!%p344_p10, %s3177_s21), 63  ;;  %3613 = vmatpush3.bf16.msra.mxu0 %v3865_v1  ;;  %3653 = vmatpush3.bf16.msra.mxu1 %v3865_v1 }
  0x19   : > { %s3178_s26 = sshll.u32 %s5425_s21, 3  ;;  %3614 = vmatprep.subr.bf16.mxu0 %v3866_v2  ;;  %3654 = vmatprep.subr.bf16.mxu1 %v3866_v2  ;;  %s340_s21 = sand.u32 1, %s3956_s10  }
  0x1a   : > { %s4081_s29 = scalar_lea.vmem %s5339_s0, %s3178_s26  ;;  %s4086_s17 = scalar_lea.vmem %s5340_s1, %s3178_s26 }
  0x1b   : > { %v359_v3 = vld [vmem:[%s4081_s29 + $0x10] sm:$0xff]  ;;  %v357_v5 = vld [vmem:[%s4081_s29] sm:$0xff]  ;;  %v360_v9 = vld [vmem:[%s4081_s29 + $0x18] sm:$0xff]  ;;  %s3176_s24 = sshll.u32 %s340_s21, 7  ;;  %s3364_s26 = sshll.u32 %s4042_s13, 11 }
  0x1c   : > { %v4090_v4 = vld [vmem:[%s4086_s17 + $0x10] sm:$0xff]  ;;  %590 = vperm.xlu1 %3864, %v359_v3   ;;  %v4097_v7 = vld [vmem:[%s4086_s17] sm:$0xff]  ;;  %584 = vperm.xlu0 %3863, %v357_v5   ;;  %v358_v10 = vld [vmem:[%s4081_s29 + $0x8] sm:$0xff]  ;;  %s5239_s25 = scalar_lea.vmem [#allocation2], %s3176_s24  ;;  %s5291_s14 = scalar_lea.hbm %s5348_s9, %s3364_s26 }
  0x1d   : > { %v4094_v6 = vsub.s32 %v4090_v4, %v359_v3  ;;  %v4100_v8 = vsub.s32 %v4097_v7, %v357_v5  ;;  %3615 = vmatpush3.bf16.msra.mxu0 %v3866_v2  ;;  %3655 = vmatpush3.bf16.msra.mxu1 %v3866_v2  ;;  %v362_v11 = vld [vmem:[%s4081_s29 + $0x28] sm:$0xff]  ;;  %v361_v12 = vld [vmem:[%s4081_s29 + $0x20] sm:$0xff]  ;;  %v364_v13 = vld [vmem:[%s4081_s29 + $0x38] sm:$0xff]  ;;  %s3098_s27 = sshll.u32 %s5239_s25, 4  ;;  %s5298_s16 = scalar_lea.sflag [#allocation3], %s340_s21  ;;  %s5293_s27 = int_to_ptr.vmem [resolvable:$true] %s3098_s27 }
  0x1e   : > { %v363_v14 = vld [vmem:[%s4081_s29 + $0x30] sm:$0xff]  ;;  %v366_v15 = vld [vmem:[%s4081_s29 + $0x48] sm:$0xff]  ;;  %v365_v16 = vld [vmem:[%s4081_s29 + $0x40] sm:$0xff]  ;;  %s3902_s13 = scalar_lea.vmem %s5293_s27, 2048 }
  0x1f   : > { %v4111_v17 = vld [vmem:[%s4086_s17 + $0x8] sm:$0xff]  ;;  %v4114_v18 = vld [vmem:[%s4086_s17 + $0x18] sm:$0xff]  ;;  %v4120_v20 = vld [vmem:[%s4081_s29 + $0x50] sm:$0xff]  ;;  %vm453_vm0 = vcmp.gt.s32.totalorder %v4100_v8, 0  ;;  %vm457_vm2 = vcmp.gt.s32.totalorder %v4094_v6, 0  ;;  %p3903_p11 = scmp.ne.s32.totalorder %s5293_s27, %s3902_s13 }
  0x20   : > { %593 = vperm.xlu1 %3864, %v360_v9   ;;  %587 = vperm.xlu0 %3863, %v358_v10   ;;  %v4117_v19 = vld [vmem:[%s4081_s29 + $0x58] sm:$0xff]  ;;  %v4123_v21 = vld [vmem:[%s4081_s29 + $0x68] sm:$0xff]  ;;  %v4126_v22 = vsub.s32 %v4111_v17, %v358_v10  ;;  %v4129_v23 = vsub.s32 %v4114_v18, %v360_v9  ;;  %v4135_v25 = vld [vmem:[%s4086_s17 + $0x20] sm:$0xff] }
  0x21   : > { %v4132_v24 = vld [vmem:[%s4086_s17 + $0x28] sm:$0xff]  ;;  %v4138_v26 = vld [vmem:[%s4086_s17 + $0x38] sm:$0xff]  ;;  %v4141_v27 = vld [vmem:[%s4081_s29 + $0x60] sm:$0xff]  ;;  %v4153_v31 = vsub.s32 %v4135_v25, %v361_v12  ;;  %p3904_p12 = pnand %p3903_p11, %p4059_p5 }
  0x22   : > { %v4144_v28 = vld [vmem:[%s4081_s29 + $0x78] sm:$0xff]  ;;  %v4147_v29 = vld [vmem:[%s4081_s29 + $0x70] sm:$0xff]  ;;  %v4150_v30 = vsub.s32 %v4132_v24, %v362_v11  ;;  %v4156_v32 = vsub.s32 %v4138_v26, %v364_v13  ;;  %v4162_v34 = vld [vmem:[%s4086_s17 + $0x48] sm:$0xff]  ;;  %vm455_vm1 = vcmp.gt.s32.totalorder %v4126_v22, 0  ;;  %vm459_vm3 = vcmp.gt.s32.totalorder %v4129_v23, 0 }
  0x23   : > { %v4159_v33 = vld [vmem:[%s4086_s17 + $0x30] sm:$0xff]  ;;  %v4165_v35 = vld [vmem:[%s4086_s17 + $0x40] sm:$0xff]  ;;  %v4168_v36 = vld [vmem:[%s4081_s29 + $0x88] sm:$0xff]  ;;  %v4180_v40 = vsub.s32 %v4162_v34, %v366_v15  ;;  %vm461_vm7 = vcmp.gt.s32.totalorder %v4153_v31, 0  ;;  %p3905_p13 = pneg %p3904_p12 }
  0x24   : > { %599 = vperm.xlu1 %3864, %v362_v11   ;;  %596 = vperm.xlu0 %3863, %v361_v12   ;;  %5375 = vst [vmem:[#allocation5_spill] sm:$0xff] %v4156_v32  ;;  %v4171_v37 = vld [vmem:[%s4081_s29 + $0x80] sm:$0xff]  ;;  %v4174_v38 = vld [vmem:[%s4081_s29 + $0x98] sm:$0xff]  ;;  %v4177_v39 = vsub.s32 %v4159_v33, %v363_v14  ;;  %v4183_v41 = vsub.s32 %v4165_v35, %v365_v16  ;;  %v4189_v43 = vld [vmem:[%s4086_s17 + $0x50] sm:$0xff]  ;;  %vm463_vm6 = vcmp.gt.s32.totalorder %v4150_v30, 0 }
  0x25   : > { %5377 = vst [vmem:[#allocation7_spill] sm:$0xff] %v4180_v40  ;;  %v4186_v42 = vld [vmem:[%s4086_s17 + $0x58] sm:$0xff]  ;;  %v4192_v44 = vld [vmem:[%s4086_s17 + $0x68] sm:$0xff]  ;;  %v4195_v45 = vld [vmem:[%s4081_s29 + $0x90] sm:$0xff]  ;;  %v4209_v49 = vsub.s32 %v4189_v43, %v4120_v20 }
  0x26   : > { %5376 = vst [vmem:[#allocation6_spill] sm:$0xff] %v4177_v39  ;;  %5378 = vst [vmem:[#allocation8_spill] sm:$0xff] %v4183_v41  ;;  %v4198_v46 = vld [vmem:[%s4081_s29 + $0xa8] sm:$0xff]  ;;  %v4201_v47 = vld [vmem:[%s4081_s29 + $0xa0] sm:$0xff]  ;;  %v4205_v48 = vsub.s32 %v4186_v42, %v4117_v19  ;;  %v4213_v50 = vsub.s32 %v4192_v44, %v4123_v21 }
  0x27   : > { %5380 = vst [vmem:[#allocation10_spill] sm:$0xff] %v4209_v49  ;;  %v4216_v51 = vld [vmem:[%s4086_s17 + $0x60] sm:$0xff]  ;;  %v4219_v52 = vld [vmem:[%s4086_s17 + $0x78] sm:$0xff]  ;;  %v4222_v53 = vld [vmem:[%s4086_s17 + $0x70] sm:$0xff] }
  0x28   : > { %605 = vperm.xlu1 %3864, %v364_v13   ;;  %602 = vperm.xlu0 %3863, %v363_v14   ;;  %5379 = vst [vmem:[#allocation9_spill] sm:$0xff] %v4205_v48  ;;  %5381 = vst [vmem:[#allocation11_spill] sm:$0xff] %v4213_v50  ;;  %v4225_v54 = vld [vmem:[%s4081_s29 + $0xb8] sm:$0xff]  ;;  %v4228_v55 = vld [vmem:[%s4081_s29 + $0xb0] sm:$0xff]  ;;  %v4235_v57 = vsub.s32 %v4216_v51, %v4141_v27  ;;  %v4239_v58 = vsub.s32 %v4219_v52, %v4144_v28 }
  0x29   : > { %v4231_v56 = vld [vmem:[%s4081_s29 + $0xc8] sm:$0xff]  ;;  %v4243_v59 = vsub.s32 %v4222_v53, %v4147_v29  ;;  %v4249_v61 = vld [vmem:[%s4086_s17 + $0x80] sm:$0xff]  ;;  %v4252_v62 = vld [vmem:[%s4086_s17 + $0x98] sm:$0xff] }
  0x2a   : > { %5382 = vst [vmem:[#allocation12_spill] sm:$0xff] %v4235_v57  ;;  %5383 = vst [vmem:[#allocation13_spill] sm:$0xff] %v4239_v58  ;;  %v4246_v60 = vld [vmem:[%s4086_s17 + $0x88] sm:$0xff]  ;;  %v381_v63 = vld [vmem:[%s4081_s29 + $0xc0] sm:$0xff]  ;;  %v4263_v5 = vsub.s32 %v4249_v61, %v4171_v37  ;;  %v4267_v9 = vsub.s32 %v4252_v62, %v4174_v38 }
  0x2b   : > { %5384 = vst [vmem:[#allocation14_spill] sm:$0xff] %v4243_v59  ;;  %v384_v1 = vld [vmem:[%s4081_s29 + $0xd8] sm:$0xff]  ;;  %v383_v2 = vld [vmem:[%s4081_s29 + $0xd0] sm:$0xff]  ;;  %v4259_v3 = vsub.s32 %v4246_v60, %v4168_v36  ;;  %v4273_v11 = vld [vmem:[%s4086_s17 + $0xa8] sm:$0xff] }
  0x2c   : > { %611 = vperm.xlu1 %3864, %v366_v15   ;;  %608 = vperm.xlu0 %3863, %v365_v16   ;;  %5386 = vst [vmem:[#allocation16_spill] sm:$0xff] %v4263_v5  ;;  %5387 = vst [vmem:[#allocation17_spill] sm:$0xff] %v4267_v9  ;;  %v4270_v10 = vld [vmem:[%s4086_s17 + $0x90] sm:$0xff]  ;;  %v4276_v12 = vld [vmem:[%s4086_s17 + $0xa0] sm:$0xff]  ;;  %v4287_v0 = vsub.s32 %v4273_v11, %v4198_v46 }
  0x2d   : > { %5385 = vst [vmem:[#allocation15_spill] sm:$0xff] %v4259_v3  ;;  %v386_v13 = vld [vmem:[%s4081_s29 + $0xe8] sm:$0xff]  ;;  %v385_v14 = vld [vmem:[%s4081_s29 + $0xe0] sm:$0xff]  ;;  %v388_v15 = vld [vmem:[%s4081_s29 + $0xf8] sm:$0xff]  ;;  %v4283_v16 = vsub.s32 %v4270_v10, %v4195_v45  ;;  %v4291_v9 = vsub.s32 %v4276_v12, %v4201_v47 }
  0x2e   : > { %5389 = vst [vmem:[#allocation19_spill] sm:$0xff] %v4287_v0  ;;  %v4294_v5 = vld [vmem:[%s4086_s17 + $0xb8] sm:$0xff]  ;;  %v4297_v3 = vld [vmem:[%s4086_s17 + $0xb0] sm:$0xff]  ;;  %v4300_v59 = vld [vmem:[%s4086_s17 + $0xc8] sm:$0xff] }
  0x2f   : > { %5388 = vst [vmem:[#allocation18_spill] sm:$0xff] %v4283_v16  ;;  %5390 = vst [vmem:[#allocation20_spill] sm:$0xff] %v4291_v9  ;;  %v4304_v16 = vsub.s32 %v4294_v5, %v4225_v54  ;;  %v4308_v58 = vsub.s32 %v4297_v3, %v4228_v55  ;;  %v4312_v0 = vsub.s32 %v4300_v59, %v4231_v56  ;;  %v4315_v9 = vld [vmem:[%s4086_s17 + $0xc0] sm:$0xff]  ;;  %v4318_v57 = vld [vmem:[%s4086_s17 + $0xd8] sm:$0xff] }
  0x30   : > { %v4321_v50 = vld [vmem:[%s4086_s17 + $0xd0] sm:$0xff]  ;;  %v4324_v49 = vsub.s32 %v4315_v9, %v381_v63  ;;  %v4336_v41 = vld [vmem:[%s4086_s17 + $0xe0] sm:$0xff]  ;;  %617 = vperm.xlu1 %3864, %v4117_v19   ;;  %614 = vperm.xlu0 %3863, %v4120_v20   ;;  %v3868_v20 = vld [vmem:[%s5341_s2 + $0x18] sm:$0xff]  }
  0x31   : > { %5391 = vst [vmem:[#allocation21_spill] sm:$0xff] %v4304_v16  ;;  %5392 = vst [vmem:[#allocation22_spill] sm:$0xff] %v4308_v58  ;;  %v4327_v16 = vsub.s32 %v4318_v57, %v384_v1  ;;  %v4330_v48 = vsub.s32 %v4321_v50, %v383_v2  ;;  %v4333_v58 = vld [vmem:[%s4086_s17 + $0xe8] sm:$0xff]  ;;  %v387_v40 = vld [vmem:[%s4081_s29 + $0xf0] sm:$0xff] }
  0x32   : > { %5393 = vst [vmem:[#allocation23_spill] sm:$0xff] %v4312_v0  ;;  %5394 = vst [vmem:[#allocation24_spill] sm:$0xff] %v4324_v49  ;;  %v4339_v0 = vld [vmem:[%s4086_s17 + $0xf8] sm:$0xff]  ;;  %v4345_v39 = vsub.s32 %v4333_v58, %v386_v13  ;;  %v4348_v49 = vsub.s32 %v4336_v41, %v385_v14  ;;  %v3867_v32 = vld [vmem:[%s5341_s2 + $0x10] sm:$0xff]  }
  0x33   : > { %5395 = vst [vmem:[#allocation25_spill] sm:$0xff] %v4327_v16  ;;  %5396 = vst [vmem:[#allocation26_spill] sm:$0xff] %v4330_v48  ;;  %v4351_v16 = vsub.s32 %v4339_v0, %v388_v15  ;;  %v4354_v48 = vld [vmem:[%s4086_s17 + $0xf0] sm:$0xff]  ;;  %3616 = vmatprep.subr.bf16.mxu0 %v3867_v32  ;;  %3656 = vmatprep.subr.bf16.mxu1 %v3867_v32  ;;  %s3968_s17 = smov [#allocation2]  }
  0x34   : > { %v4360_v19 = vsub.s32 %v4354_v48, %v387_v40  ;;  %3617 = vmatpush3.bf16.msra.mxu0 %v3867_v32  ;;  %3657 = vmatpush3.bf16.msra.mxu1 %v3867_v32  ;;  %s3906_s22 = sshll.u32 %s3968_s17, 4  ;;  %s3907_s22 = int_to_ptr.vmem [resolvable:$false] %s3906_s22 }
  0x35   : > { %623 = vperm.xlu1 %3864, %v4123_v21   ;;  %620 = vperm.xlu0 %3863, %v4141_v27   ;;  %v458_v21 = vsel %vm457_vm2, %v4094_v6, 0  ;;  %v5397_v6 = vld [vmem:[#allocation5_spill] sm:$0xff]  ;;  %s3908_s23 = scalar_lea.vmem %s3907_s22, 4096  ;;  %p3909_p0 = scmp.lt.s32.totalorder %s5293_s27, %s3907_s22 }
  0x36   : > { %3618 = vmatprep.subr.bf16.mxu0 %v3868_v20  ;;  %3658 = vmatprep.subr.bf16.mxu1 %v3868_v20  ;;  %vm521_vm9 = vcmp.lt.s32.totalorder %v458_v21, 19  ;;  %vm467_vm11 = vcmp.gt.s32.totalorder %v5397_v6, 0  ;;  %p3910_p1 = scmp.lt.s32.totalorder %s3908_s23, %s3902_s13 }
  0x38   : > { %3619 = vmatpush3.bf16.msra.mxu0 %v3868_v20  ;;  %3659 = vmatpush3.bf16.msra.mxu1 %v3868_v20  ;;  %p3911_p2 = por %p3910_p1, %p3909_p0 }
  0x39   : > { %629 = vperm.xlu1 %3864, %v4144_v28   ;;  %626 = vperm.xlu0 %3863, %v4147_v29   ;;  %v522_v29 = vsel %vm521_vm9, %v458_v21, 19 }
  0x3a   : > { %p3912_p3 = pnand %p3911_p2, %p3905_p13 }
  0x3d   : > { %635 = vperm.xlu1 %3864, %v4168_v36   ;;  %632 = vperm.xlu0 %3863, %v4171_v37   ;;  %v5400_v36 = vld [vmem:[#allocation8_spill] sm:$0xff]  ;;  %v3967_v37 = vmov 0.0  }
  0x41   : > { %641 = vperm.xlu1 %3864, %v4174_v38   ;;  %638 = vperm.xlu0 %3863, %v4195_v45  }
  0x45   : > { %647 = vperm.xlu1 %3864, %v4198_v46   ;;  %644 = vperm.xlu0 %3863, %v4201_v47  }
  0x49   : > { %653 = vperm.xlu1 %3864, %v4225_v54   ;;  %650 = vperm.xlu0 %3863, %v4228_v55   ;;  %v5402_v55 = vld [vmem:[#allocation10_spill] sm:$0xff] }
  0x4d   : > { %659 = vperm.xlu1 %3864, %v4231_v56   ;;  %656 = vperm.xlu0 %3863, %v381_v63  }
  0x51   : > { %665 = vperm.xlu1 %3864, %v384_v1   ;;  %662 = vperm.xlu0 %3863, %v383_v2  }
  0x55   : > { %671 = vperm.xlu1 %3864, %v386_v13   ;;  %668 = vperm.xlu0 %3863, %v385_v14   ;;  %v5405_v14 = vld [vmem:[#allocation13_spill] sm:$0xff] }
  0x59   : > { %677 = vperm.xlu1 %3864, %v388_v15   ;;  %674 = vperm.xlu0 %3863, %v387_v40  }
  0x5d   : > { %763 = vperm.xlu1 %3864, %v4111_v17   ;;  %760 = vperm.xlu0 %3863, %v4097_v7   ;;  %v454_v7 = vsel %vm453_vm0, %v4100_v8, 0  ;;  %v581_v17 = vlaneseq }
  0x5e   : > { %vm517_vm5 = vcmp.lt.s32.totalorder %v454_v7, 19 }
  0x61   : > { %769 = vperm.xlu1 %3864, %v4114_v18   ;;  %766 = vperm.xlu0 %3863, %v4090_v4   ;;  %v456_v4 = vsel %vm455_vm1, %v4126_v22, 0  ;;  %v460_v18 = vsel %vm459_vm3, %v4129_v23, 0  ;;  %v518_v22 = vsel %vm517_vm5, %v454_v7, 19  ;;  %v5398_v23 = vld [vmem:[#allocation6_spill] sm:$0xff] }
  0x62   : > { %vm519_vm4 = vcmp.lt.s32.totalorder %v456_v4, 19  ;;  %vm523_vm8 = vcmp.lt.s32.totalorder %v460_v18, 19  ;;  %vm465_vm12 = vcmp.gt.s32.totalorder %v5398_v23, 0  ;;  %v5406_v7 = vld [vmem:[#allocation14_spill] sm:$0xff] }
  0x63   : > { %v520_v8 = vsel %vm519_vm4, %v456_v4, 19  ;;  %v524_v28 = vsel %vm523_vm8, %v460_v18, 19  ;;  %vm469_vm4 = vcmp.gt.s32.totalorder %v5400_v36, 0 }
  0x65   : > { %775 = vperm.xlu1 %3864, %v4132_v24   ;;  %772 = vperm.xlu0 %3863, %v4135_v25   ;;  %v464_v24 = vsel %vm463_vm6, %v4150_v30, 0  ;;  %v4422_v25 = vand.u32 127, %v581_v17 }
  0x66   : > { %vm527_vm10 = vcmp.lt.s32.totalorder %v464_v24, 19 }
  0x69   : > { %781 = vperm.xlu1 %3864, %v4138_v26   ;;  %778 = vperm.xlu0 %3863, %v4159_v33   ;;  %v528_v33 = vsel %vm527_vm10, %v464_v24, 19  ;;  %vm473_vm10 = vcmp.gt.s32.totalorder %v5402_v55, 0 }
  0x6d   : > { %787 = vperm.xlu1 %3864, %v4162_v34   ;;  %784 = vperm.xlu0 %3863, %v4165_v35   ;;  %v468_v34 = vsel %vm467_vm11, %v5397_v6, 0  ;;  %v466_v35 = vsel %vm465_vm12, %v5398_v23, 0 }
  0x6e   : > { %vm531_vm5 = vcmp.lt.s32.totalorder %v468_v34, 19  ;;  %vm529_vm6 = vcmp.lt.s32.totalorder %v466_v35, 19 }
  0x6f   : > { %v532_v54 = vsel %vm531_vm5, %v468_v34, 19 }
  0x71   : > { %793 = vperm.xlu1 %3864, %v4186_v42   ;;  %790 = vperm.xlu0 %3863, %v4189_v43  }
  0x75   : > { %799 = vperm.xlu1 %3864, %v4192_v44   ;;  %796 = vperm.xlu0 %3863, %v4216_v51   ;;  %v5401_v51 = vld [vmem:[#allocation9_spill] sm:$0xff] }
  0x76   : > { %vm475_vm9 = vcmp.gt.s32.totalorder %v5401_v51, 0 }
  0x79   : > { %805 = vperm.xlu1 %3864, %v4219_v52   ;;  %802 = vperm.xlu0 %3863, %v4222_v53  }
  0x7d   : > { %811 = vperm.xlu1 %3864, %v4246_v60   ;;  %808 = vperm.xlu0 %3863, %v4249_v61   ;;  %v476_v60 = vsel %vm475_vm9, %v5401_v51, 0  ;;  %v474_v61 = vsel %vm473_vm10, %v5402_v55, 0 }
  0x81   : > { %817 = vperm.xlu1 %3864, %v4252_v62   ;;  %814 = vperm.xlu0 %3863, %v4270_v10   ;;  %v5403_v62 = vld [vmem:[#allocation11_spill] sm:$0xff] }
  0x85   : > { %823 = vperm.xlu1 %3864, %v4273_v11   ;;  %820 = vperm.xlu0 %3863, %v4276_v12  }
  0x89   : > { %829 = vperm.xlu1 %3864, %v4294_v5   ;;  %826 = vperm.xlu0 %3863, %v4297_v3   ;;  %v5404_v3 = vld [vmem:[#allocation12_spill] sm:$0xff] }
  0x8d   : > { %835 = vperm.xlu1 %3864, %v4300_v59   ;;  %832 = vperm.xlu0 %3863, %v4315_v9  }
  0x91   : > { %841 = vperm.xlu1 %3864, %v4318_v57   ;;  %838 = vperm.xlu0 %3863, %v4321_v50   ;;  %v470_v50 = vsel %vm469_vm4, %v5400_v36, 0  ;;  %v530_v57 = vsel %vm529_vm6, %v466_v35, 19  ;;  %vm483_vm6 = vcmp.gt.s32.totalorder %v5405_v14, 0 }
  0x92   : > { %vm533_vm12 = vcmp.lt.s32.totalorder %v470_v50, 19  ;;  %v484_v24 = vsel %vm483_vm6, %v5405_v14, 0  ;;  %v5415_v14 = vld [vmem:[#allocation23_spill] sm:$0xff] }
  0x93   : > { %v534_v9 = vsel %vm533_vm12, %v470_v50, 19 }
  0x95   : > { %847 = vperm.xlu1 %3864, %v4333_v58   ;;  %844 = vperm.xlu0 %3863, %v4336_v41  }
  0x99   : > { %853 = vperm.xlu1 %3864, %v4339_v0   ;;  %850 = vperm.xlu0 %3863, %v4354_v48   ;;  %v462_v0 = vsel %vm461_vm7, %v4153_v31, 0  ;;  %v5399_v31 = vld [vmem:[#allocation7_spill] sm:$0xff] }
  0x9a   : > { %vm525_vm0 = vcmp.lt.s32.totalorder %v462_v0, 19  ;;  %vm471_vm3 = vcmp.gt.s32.totalorder %v5399_v31, 0 }
  0x9b   : > { %v591_v26 = vpop.permute.xlu1 %590  ;;  %v585_v27 = vpop.permute.xlu0 %584  ;;  %v526_v45 = vsel %vm525_vm0, %v462_v0, 19  ;;  %v472_v48 = vsel %vm471_vm3, %v5399_v31, 0  ;;  %vm479_vm0 = vcmp.gt.s32.totalorder %v5403_v62, 0  ;;  %vm537_vm3 = vcmp.lt.s32.totalorder %v474_v61, 19  ;;  %v5409_v31 = vld [vmem:[#allocation17_spill] sm:$0xff] }
  0x9c   : > { %vm681_vm13 = vcmp.eq.s32.totalorder %v4422_v25, %v591_v26  ;;  %vm679_vm14 = vcmp.eq.s32.totalorder %v4422_v25, %v585_v27  ;;  %vm535_vm11 = vcmp.lt.s32.totalorder %v472_v48, 19  ;;  %v480_v12 = vsel %vm479_vm0, %v5403_v62, 0  ;;  %v5407_v27 = vld [vmem:[#allocation15_spill] sm:$0xff] }
  0x9d   : > { %939 = vperm.xlu1 %3864, %v520_v8   ;;  %936 = vperm.xlu0 %3863, %v518_v22   ;;  %v713_v38 = vsel %vm681_vm13, 1.0, %v3967_v37  ;;  %v711_v40 = vsel %vm679_vm14, 1.0, %v3967_v37  ;;  %v536_v2 = vsel %vm535_vm11, %v472_v48, 19  ;;  %v538_v21 = vsel %vm537_vm3, %v474_v61, 19  ;;  %v5411_v48 = vld [vmem:[#allocation19_spill] sm:$0xff] }
  0x9e   : > { %vm487_vm12 = vcmp.gt.s32.totalorder %v5407_v27, 0  ;;  %vm491_vm3 = vcmp.gt.s32.totalorder %v5409_v31, 0 }
  0x9f   : > { %v594_v30 = vpop.permute.xlu1 %593  ;;  %v588_v32 = vpop.permute.xlu0 %587  ;;  %v488_v34 = vsel %vm487_vm12, %v5407_v27, 0  ;;  %v5417_v27 = vld [vmem:[#allocation25_spill] sm:$0xff] }
  0xa0   : > { %vm682_vm1 = vcmp.eq.s32.totalorder %v4422_v25, %v594_v30  ;;  %vm680_vm2 = vcmp.eq.s32.totalorder %v4422_v25, %v588_v32 }
  0xa1   : > { %945 = vperm.xlu1 %3864, %v524_v28   ;;  %942 = vperm.xlu0 %3863, %v522_v29   ;;  %v714_v41 = vsel %vm682_vm1, 1.0, %v3967_v37  ;;  %v712_v42 = vsel %vm680_vm2, 1.0, %v3967_v37  ;;  %vm477_vm1 = vcmp.gt.s32.totalorder %v5404_v3, 0  ;;  %vm539_vm2 = vcmp.lt.s32.totalorder %v476_v60, 19  ;;  %v5408_v28 = vld [vmem:[#allocation16_spill] sm:$0xff] }
  0xa2   : > { %v744_v43 = vpack.c.bf16 %v714_v41, %v713_v38  ;;  %v743_v44 = vpack.c.bf16 %v712_v42, %v711_v40  ;;  %v478_v13 = vsel %vm477_vm1, %v5404_v3, 0  ;;  %v540_v4 = vsel %vm539_vm2, %v476_v60, 19  ;;  %v5410_v41 = vld [vmem:[#allocation18_spill] sm:$0xff]  ;;  %v5413_v60 = vld [vmem:[#allocation21_spill] sm:$0xff] }
  0xa3   : > { %v600_v46 = vpop.permute.xlu1 %599  ;;  %v597_v47 = vpop.permute.xlu0 %596  ;;  %vm541_vm9 = vcmp.lt.s32.totalorder %v478_v13, 19 }
  0xa4   : > { %vm684_vm7 = vcmp.eq.s32.totalorder %v4422_v25, %v600_v46  ;;  %vm683_vm8 = vcmp.eq.s32.totalorder %v4422_v25, %v597_v47  ;;  %3620 = vmatprep.mubr.msk.bf16.mxu0 %vm1143_vm15, %v743_v44  ;;  %v542_v30 = vsel %vm541_vm9, %v478_v13, 19  ;;  %v492_v46 = vsel %vm491_vm3, %v5409_v31, 0 }
  0xa5   : > { %951 = vperm.xlu1 %3864, %v528_v33   ;;  %v716_v52 = vsel %vm684_vm7, 1.0, %v3967_v37  ;;  %v715_v53 = vsel %vm683_vm8, 1.0, %v3967_v37  ;;  %948 = vperm.xlu0 %3863, %v526_v45   ;;  %vm481_vm7 = vcmp.gt.s32.totalorder %v5406_v7, 0  ;;  %vm543_vm8 = vcmp.lt.s32.totalorder %v480_v12, 19 }
  0xa6   : > { %3621 = vmatmul.mubr.msk.bf16.vlgmr.msra.gmra.mrb[0].mxu0 %vm1143_vm15, %v744_v43  ;;  %v745_v56 = vpack.c.bf16 %v716_v52, %v715_v53  ;;  %v482_v26 = vsel %vm481_vm7, %v5406_v7, 0  ;;  %v544_v23 = vsel %vm543_vm8, %v480_v12, 19  ;;  %vm495_vm9 = vcmp.gt.s32.totalorder %v5411_v48, 0  ;;  %v5412_v53 = vld [vmem:[#allocation20_spill] sm:$0xff]  ;;  %v3871_v12 = vld [vmem:[%s5342_s3 + $0x4] ss:$8 sps:$4 sm:$0xff]  }
  0xa7   : > { %v606_v58 = vpop.permute.xlu1 %605  ;;  %v603_v59 = vpop.permute.xlu0 %602  ;;  %vm545_vm0 = vcmp.lt.s32.totalorder %v482_v26, 19  ;;  %v5416_v7 = vld [vmem:[#allocation24_spill] sm:$0xff]  ;;  %1932 = vmatprep.subr.bf16.mxu0 %v3871_v12 }
  0xa8   : > { %vm686_vm13 = vcmp.eq.s32.totalorder %v4422_v25, %v606_v58  ;;  %vm685_vm14 = vcmp.eq.s32.totalorder %v4422_v25, %v603_v59  ;;  %3624 = vmatprep.mubr.msk.bf16.mxu0 %vm1143_vm15, %v745_v56  ;;  %v546_v43 = vsel %vm545_vm0, %v482_v26, 19  ;;  %v496_v58 = vsel %vm495_vm9, %v5411_v48, 0  ;;  %v3872_v12 = vld [vmem:[%s5342_s3 + $0x10] ss:$8 sps:$4 sm:$0xff]  }
  0xa9   : > { %957 = vperm.xlu1 %3864, %v532_v54   ;;  %v718_v63 = vsel %vm686_vm13, 1.0, %v3967_v37  ;;  %v717_v1 = vsel %vm685_vm14, 1.0, %v3967_v37  ;;  %954 = vperm.xlu0 %3863, %v530_v57   ;;  %vm485_vm13 = vcmp.gt.s32.totalorder %v5408_v28, 0  ;;  %vm547_vm14 = vcmp.lt.s32.totalorder %v484_v24, 19 }
  0xaa   : > { %v746_v5 = vpack.c.bf16 %v718_v63, %v717_v1  ;;  %v486_v35 = vsel %vm485_vm13, %v5408_v28, 0  ;;  %v548_v40 = vsel %vm547_vm14, %v484_v24, 19  ;;  %vm499_vm0 = vcmp.gt.s32.totalorder %v5413_v60, 0  ;;  %v5414_v1 = vld [vmem:[#allocation22_spill] sm:$0xff] }
  0xab   : > { %v612_v10 = vpop.permute.xlu1 %611  ;;  %v609_v11 = vpop.permute.xlu0 %608  ;;  %vm549_vm6 = vcmp.lt.s32.totalorder %v486_v35, 19  ;;  %v5418_v28 = vld [vmem:[#allocation26_spill] sm:$0xff] }
  0xac   : > { %vm688_vm4 = vcmp.eq.s32.totalorder %v4422_v25, %v612_v10  ;;  %vm687_vm5 = vcmp.eq.s32.totalorder %v4422_v25, %v609_v11  ;;  %v550_v55 = vsel %vm549_vm6, %v486_v35, 19  ;;  %v500_v10 = vsel %vm499_vm0, %v5413_v60, 0  ;;  %v3869_v11 = vld [vmem:[%s5342_s3] ss:$8 sps:$4 sm:$0xff]  }
  0xad   : > { %963 = vperm.xlu1 %3864, %v536_v2   ;;  %v720_v15 = vsel %vm688_vm4, 1.0, %v3967_v37  ;;  %v719_v20 = vsel %vm687_vm5, 1.0, %v3967_v37  ;;  %960 = vperm.xlu0 %3863, %v534_v9   ;;  %vm489_vm4 = vcmp.gt.s32.totalorder %v5410_v41, 0  ;;  %vm551_vm5 = vcmp.lt.s32.totalorder %v488_v34, 19 }
  0xae   : > { %3625 = vmatmul.mubr.msk.bf16.gmra.mrb[4].mxu0 %vm1143_vm15, %v746_v5  ;;  %v747_v18 = vpack.c.bf16 %v720_v15, %v719_v20  ;;  %v490_v47 = vsel %vm489_vm4, %v5410_v41, 0  ;;  %v552_v52 = vsel %vm551_vm5, %v488_v34, 19  ;;  %vm503_vm6 = vcmp.gt.s32.totalorder %v5415_v14, 0 }
  0xaf   : > { %v618_v8 = vpop.permute.xlu1 %617  ;;  %v615_v22 = vpop.permute.xlu0 %614  ;;  %vm553_vm12 = vcmp.lt.s32.totalorder %v490_v47, 19  ;;  %1933 = vmatpush1.bf16.msra.mxu0 %v3869_v11  ;;  %v504_v24 = vsel %vm503_vm6, %v5415_v14, 0 }
  0xb0   : > { %vm690_vm10 = vcmp.eq.s32.totalorder %v4422_v25, %v618_v8  ;;  %vm689_vm11 = vcmp.eq.s32.totalorder %v4422_v25, %v615_v22  ;;  %3628 = vmatprep.mubr.msk.bf16.mxu0 %vm1143_vm15, %v747_v18  ;;  %v554_v3 = vsel %vm553_vm12, %v490_v47, 19  ;;  %vm507_vm12 = vcmp.gt.s32.totalorder %v5417_v27, 0 }
  0xb1   : > { %969 = vperm.xlu1 %3864, %v540_v4   ;;  %v722_v0 = vsel %vm690_vm10, 1.0, %v3967_v37  ;;  %v721_v6 = vsel %vm689_vm11, 1.0, %v3967_v37  ;;  %966 = vperm.xlu0 %3863, %v538_v21   ;;  %vm493_vm10 = vcmp.gt.s32.totalorder %v5412_v53, 0  ;;  %vm555_vm11 = vcmp.lt.s32.totalorder %v492_v46, 19 }
  0xb2   : > { %v748_v29 = vpack.c.bf16 %v722_v0, %v721_v6  ;;  %v494_v59 = vsel %vm493_vm10, %v5412_v53, 0  ;;  %v556_v63 = vsel %vm555_vm11, %v492_v46, 19  ;;  %v508_v34 = vsel %vm507_vm12, %v5417_v27, 0 }
  0xb3   : > { %vm557_vm3 = vcmp.lt.s32.totalorder %v494_v59, 19 }
  0xb4   : > { %v624_v32 = vpop.permute.xlu1 %623  ;;  %v621_v33 = vpop.permute.xlu0 %620  ;;  %v558_v21 = vsel %vm557_vm3, %v494_v59, 19  ;;  %vm511_vm3 = vcmp.gt.s32.totalorder %v4345_v39, 0 }
  0xb5   : > { %vm692_vm1 = vcmp.eq.s32.totalorder %v4422_v25, %v624_v32  ;;  %vm691_vm2 = vcmp.eq.s32.totalorder %v4422_v25, %v621_v33  ;;  %975 = vperm.xlu1 %3864, %v544_v23   ;;  %972 = vperm.xlu0 %3863, %v542_v30  }
  0xb6   : > { %v724_v36 = vsel %vm692_vm1, 1.0, %v3967_v37  ;;  %v723_v38 = vsel %vm691_vm2, 1.0, %v3967_v37  ;;  %3629 = vmatmul.mubr.msk.bf16.gmra.mrb[8].mxu0 %vm1143_vm15, %v748_v29  ;;  %vm497_vm1 = vcmp.gt.s32.totalorder %v5414_v1, 0  ;;  %vm559_vm2 = vcmp.lt.s32.totalorder %v496_v58, 19 }
  0xb7   : > { %v749_v42 = vpack.c.bf16 %v724_v36, %v723_v38  ;;  %v498_v13 = vsel %vm497_vm1, %v5414_v1, 0  ;;  %v560_v4 = vsel %vm559_vm2, %v496_v58, 19 }
  0xb8   : > { %v630_v44 = vpop.permute.xlu1 %629  ;;  %v627_v45 = vpop.permute.xlu0 %626  ;;  %vm561_vm9 = vcmp.lt.s32.totalorder %v498_v13, 19 }
  0xb9   : > { %vm694_vm7 = vcmp.eq.s32.totalorder %v4422_v25, %v630_v44  ;;  %vm693_vm8 = vcmp.eq.s32.totalorder %v4422_v25, %v627_v45  ;;  %981 = vperm.xlu1 %3864, %v548_v40   ;;  %3632 = vmatprep.mubr.msk.bf16.mxu0 %vm1143_vm15, %v749_v42  ;;  %v562_v30 = vsel %vm561_vm9, %v498_v13, 19  ;;  %v512_v44 = vsel %vm511_vm3, %v4345_v39, 0  ;;  %v3874_v13 = vld [vmem:[%s5342_s3 + $0x14] ss:$8 sps:$4 sm:$0xff]  }
  0xba   : > { %v726_v50 = vsel %vm694_vm7, 1.0, %v3967_v37  ;;  %v725_v51 = vsel %vm693_vm8, 1.0, %v3967_v37  ;;  %978 = vperm.xlu0 %3863, %v546_v43   ;;  %vm501_vm7 = vcmp.gt.s32.totalorder %v5416_v7, 0  ;;  %vm563_vm8 = vcmp.lt.s32.totalorder %v500_v10, 19  ;;  %1934 = vmatprep.subr.bf16.mxu0 %v3874_v13 }
  0xbb   : > { %v750_v54 = vpack.c.bf16 %v726_v50, %v725_v51  ;;  %v502_v26 = vsel %vm501_vm7, %v5416_v7, 0  ;;  %v564_v23 = vsel %vm563_vm8, %v500_v10, 19  ;;  %vm515_vm9 = vcmp.gt.s32.totalorder %v4351_v16, 0  ;;  %1935 = vmatpush1.bf16.msra.mxu0 %v3872_v12 }
  0xbc   : > { %v636_v56 = vpop.permute.xlu1 %635  ;;  %v633_v57 = vpop.permute.xlu0 %632  ;;  %vm565_vm0 = vcmp.lt.s32.totalorder %v502_v26, 19 }
  0xbd   : > { %vm696_vm13 = vcmp.eq.s32.totalorder %v4422_v25, %v636_v56  ;;  %vm695_vm14 = vcmp.eq.s32.totalorder %v4422_v25, %v633_v57  ;;  %987 = vperm.xlu1 %3864, %v552_v52   ;;  %v566_v41 = vsel %vm565_vm0, %v502_v26, 19 }
  0xbe   : > { %v728_v61 = vsel %vm696_vm13, 1.0, %v3967_v37  ;;  %v727_v62 = vsel %vm695_vm14, 1.0, %v3967_v37  ;;  %984 = vperm.xlu0 %3863, %v550_v55   ;;  %3633 = vmatmul.mubr.msk.bf16.gmra.mrb[12].mxu0 %vm1143_vm15, %v750_v54  ;;  %vm505_vm13 = vcmp.gt.s32.totalorder %v5418_v28, 0  ;;  %vm567_vm14 = vcmp.lt.s32.totalorder %v504_v24, 19 }
  0xbf   : > { %v751_v2 = vpack.c.bf16 %v728_v61, %v727_v62  ;;  %v506_v35 = vsel %vm505_vm13, %v5418_v28, 0  ;;  %v568_v38 = vsel %vm567_vm14, %v504_v24, 19 }
  0xc0   : > { %v642_v5 = vpop.permute.xlu1 %641  ;;  %v639_v9 = vpop.permute.xlu0 %638  ;;  %vm569_vm6 = vcmp.lt.s32.totalorder %v506_v35, 19 }
  0xc1   : > { %vm698_vm4 = vcmp.eq.s32.totalorder %v4422_v25, %v642_v5  ;;  %vm697_vm5 = vcmp.eq.s32.totalorder %v4422_v25, %v639_v9  ;;  %993 = vperm.xlu1 %3864, %v556_v63   ;;  %3636 = vmatprep.mubr.msk.bf16.mxu0 %vm1143_vm15, %v751_v2  ;;  %v570_v50 = vsel %vm569_vm6, %v506_v35, 19 }
  0xc2   : > { %v730_v15 = vsel %vm698_vm4, 1.0, %v3967_v37  ;;  %v729_v20 = vsel %vm697_vm5, 1.0, %v3967_v37  ;;  %990 = vperm.xlu0 %3863, %v554_v3   ;;  %vm509_vm4 = vcmp.gt.s32.totalorder %v4348_v49, 0  ;;  %vm571_vm5 = vcmp.lt.s32.totalorder %v508_v34, 19 }
  0xc3   : > { %v752_v18 = vpack.c.bf16 %v730_v15, %v729_v20  ;;  %v510_v45 = vsel %vm509_vm4, %v4348_v49, 0  ;;  %v572_v48 = vsel %vm571_vm5, %v508_v34, 19  ;;  %v516_v49 = vsel %vm515_vm9, %v4351_v16, 0 }
  0xc4   : > { %v648_v8 = vpop.permute.xlu1 %647  ;;  %v645_v22 = vpop.permute.xlu0 %644  ;;  %vm573_vm12 = vcmp.lt.s32.totalorder %v510_v45, 19  ;;  %vm579_vm0 = vcmp.lt.s32.totalorder %v516_v49, 19 }
  0xc5   : > { %vm700_vm10 = vcmp.eq.s32.totalorder %v4422_v25, %v648_v8  ;;  %vm699_vm11 = vcmp.eq.s32.totalorder %v4422_v25, %v645_v22  ;;  %999 = vperm.xlu1 %3864, %v560_v4   ;;  %v574_v58 = vsel %vm573_vm12, %v510_v45, 19  ;;  %v580_v61 = vsel %vm579_vm0, %v516_v49, 19 }
  0xc6   : > { %v732_v0 = vsel %vm700_vm10, 1.0, %v3967_v37  ;;  %v731_v6 = vsel %vm699_vm11, 1.0, %v3967_v37  ;;  %996 = vperm.xlu0 %3863, %v558_v21   ;;  %3637 = vmatmul.mubr.msk.bf16.gmra.mrb[16].mxu0 %vm1143_vm15, %v752_v18  ;;  %vm513_vm10 = vcmp.gt.s32.totalorder %v4360_v19, 0  ;;  %vm575_vm11 = vcmp.lt.s32.totalorder %v512_v44, 19 }
  0xc7   : > { %v753_v29 = vpack.c.bf16 %v732_v0, %v731_v6  ;;  %v514_v53 = vsel %vm513_vm10, %v4360_v19, 0  ;;  %v576_v56 = vsel %vm575_vm11, %v512_v44, 19  ;;  %v5419_v4 = vmov 0  }
  0xc8   : > { %v654_v32 = vpop.permute.xlu1 %653  ;;  %v651_v33 = vpop.permute.xlu0 %650 }
  0xc9   : > { %vm702_vm1 = vcmp.eq.s32.totalorder %v4422_v25, %v654_v32  ;;  %vm701_vm2 = vcmp.eq.s32.totalorder %v4422_v25, %v651_v33  ;;  %1005 = vperm.xlu1 %3864, %v564_v23   ;;  %3640 = vmatprep.mubr.msk.bf16.mxu0 %vm1143_vm15, %v753_v29 }
  0xca   : > { %v734_v31 = vsel %vm702_vm1, 1.0, %v3967_v37  ;;  %v733_v36 = vsel %vm701_vm2, 1.0, %v3967_v37  ;;  %1002 = vperm.xlu0 %3863, %v562_v30   ;;  %vm577_vm1 = vcmp.lt.s32.totalorder %v514_v53, 19 }
  0xcb   : > { %v754_v40 = vpack.c.bf16 %v734_v31, %v733_v36  ;;  %v578_v63 = vsel %vm577_vm1, %v514_v53, 19 }
  0xcc   : > { %v660_v42 = vpop.permute.xlu1 %659  ;;  %v657_v43 = vpop.permute.xlu0 %656 }
  0xcd   : > { %vm704_vm7 = vcmp.eq.s32.totalorder %v4422_v25, %v660_v42  ;;  %vm703_vm8 = vcmp.eq.s32.totalorder %v4422_v25, %v657_v43  ;;  %1011 = vperm.xlu1 %3864, %v568_v38  }
  0xce   : > { %v736_v46 = vsel %vm704_vm7, 1.0, %v3967_v37  ;;  %v735_v47 = vsel %vm703_vm8, 1.0, %v3967_v37  ;;  %1008 = vperm.xlu0 %3863, %v566_v41   ;;  %3641 = vmatmul.mubr.msk.bf16.gmra.mrb[20].mxu0 %vm1143_vm15, %v754_v40 }
  0xcf   : > { %v755_v39 = vpack.c.bf16 %v736_v46, %v735_v47 }
  0xd0   : > { %v666_v51 = vpop.permute.xlu1 %665  ;;  %v663_v52 = vpop.permute.xlu0 %662 }
  0xd1   : > { %vm706_vm13 = vcmp.eq.s32.totalorder %v4422_v25, %v666_v51  ;;  %vm705_vm14 = vcmp.eq.s32.totalorder %v4422_v25, %v663_v52  ;;  %1017 = vperm.xlu1 %3864, %v572_v48   ;;  %3644 = vmatprep.mubr.msk.bf16.mxu0 %vm1143_vm15, %v755_v39 }
  0xd2   : > { %v738_v54 = vsel %vm706_vm13, 1.0, %v3967_v37  ;;  %v737_v55 = vsel %vm705_vm14, 1.0, %v3967_v37  ;;  %1014 = vperm.xlu0 %3863, %v570_v50  }
  0xd3   : > { %v756_v57 = vpack.c.bf16 %v738_v54, %v737_v55  ;;  %v3877_v55 = vld [vmem:[%s5344_s5 + $0x4] ss:$8 sps:$4 sm:$0xff]  }
  0xd4   : > { %v672_v59 = vpop.permute.xlu1 %671  ;;  %v669_v16 = vpop.permute.xlu0 %668  ;;  %2199 = vmatprep.subr.bf16.mxu0 %v3877_v55 }
  0xd5   : > { %vm708_vm2 = vcmp.eq.s32.totalorder %v4422_v25, %v672_v59  ;;  %vm707_vm3 = vcmp.eq.s32.totalorder %v4422_v25, %v669_v16  ;;  %1023 = vperm.xlu1 %3864, %v576_v56  }
  0xd6   : > { %v740_v60 = vsel %vm708_vm2, 1.0, %v3967_v37  ;;  %v739_v19 = vsel %vm707_vm3, 1.0, %v3967_v37  ;;  %1020 = vperm.xlu0 %3863, %v574_v58   ;;  %3645 = vmatmul.mubr.msk.bf16.gmra.mrb[24].mxu0 %vm1143_vm15, %v756_v57 }
  0xd7   : > { %v757_v62 = vpack.c.bf16 %v740_v60, %v739_v19 }
  0xd8   : > { %v678_v1 = vpop.permute.xlu1 %677  ;;  %v675_v2 = vpop.permute.xlu0 %674 }
  0xd9   : > { %vm710_vm4 = vcmp.eq.s32.totalorder %v4422_v25, %v678_v1  ;;  %vm709_vm5 = vcmp.eq.s32.totalorder %v4422_v25, %v675_v2  ;;  %1029 = vperm.xlu1 %3864, %v580_v61   ;;  %3648 = vmatprep.mubr.msk.bf16.mxu0 %vm1143_vm15, %v757_v62 }
  0xda   : > { %v742_v3 = vsel %vm710_vm4, 1.0, %v3967_v37  ;;  %v741_v5 = vsel %vm709_vm5, 1.0, %v3967_v37  ;;  %1026 = vperm.xlu0 %3863, %v578_v63  }
  0xdb   : > { %v758_v9 = vpack.c.bf16 %v742_v3, %v741_v5 }
  0xdc   : > { %v764_v10 = vpop.permute.xlu1 %763  ;;  %v761_v11 = vpop.permute.xlu0 %760 }
  0xdd   : > { %vm856_vm6 = vcmp.eq.s32.totalorder %v4422_v25, %v764_v10  ;;  %vm855_vm7 = vcmp.eq.s32.totalorder %v4422_v25, %v761_v11 }
  0xde   : > { %v888_v14 = vsel %vm856_vm6, 1.0, %v3967_v37  ;;  %v887_v15 = vsel %vm855_vm7, 1.0, %v3967_v37  ;;  %3649 = vmatmul.mubr.msk.bf16.gmra.mrb[28].mxu0 %vm1143_vm15, %v758_v9 }
  0xdf   : > { %v919_v20 = vpack.c.bf16 %v888_v14, %v887_v15  ;;  %1964 = vmatprep.mubr.bf16.mxu0 %v5419_v4 }
  0xe0   : > { %v770_v7 = vpop.permute.xlu1 %769  ;;  %v767_v18 = vpop.permute.xlu0 %766 }
  0xe1   : > { %vm858_vm8 = vcmp.eq.s32.totalorder %v4422_v25, %v770_v7  ;;  %vm857_vm9 = vcmp.eq.s32.totalorder %v4422_v25, %v767_v18  ;;  %3660 = vmatprep.mubr.msk.bf16.mxu1 %vm1143_vm15, %v919_v20 }
  0xe2   : > { %v890_v21 = vsel %vm858_vm8, 1.0, %v3967_v37  ;;  %v889_v8 = vsel %vm857_vm9, 1.0, %v3967_v37 }
  0xe3   : > { %v920_v22 = vpack.c.bf16 %v890_v21, %v889_v8 }
  0xe4   : > { %v776_v24 = vpop.permute.xlu1 %775  ;;  %v773_v26 = vpop.permute.xlu0 %772 }
  0xe5   : > { %vm860_vm10 = vcmp.eq.s32.totalorder %v4422_v25, %v776_v24  ;;  %vm859_vm11 = vcmp.eq.s32.totalorder %v4422_v25, %v773_v26  ;;  %3661 = vmatmul.mubr.msk.bf16.vlgmr.msra.gmra.mrb[0].mxu1 %vm1143_vm15, %v920_v22 }
  0xe6   : > { %v892_v27 = vsel %vm860_vm10, 1.0, %v3967_v37  ;;  %v891_v0 = vsel %vm859_vm11, 1.0, %v3967_v37 }
  0xe7   : > { %v921_v6 = vpack.c.bf16 %v892_v27, %v891_v0 }
  0xe8   : > { %v782_v23 = vpop.permute.xlu1 %781  ;;  %v779_v28 = vpop.permute.xlu0 %778 }
  0xe9   : > { %vm862_vm12 = vcmp.eq.s32.totalorder %v4422_v25, %v782_v23  ;;  %vm861_vm13 = vcmp.eq.s32.totalorder %v4422_v25, %v779_v28  ;;  %3664 = vmatprep.mubr.msk.bf16.mxu1 %vm1143_vm15, %v921_v6 }
  0xea   : > { %v894_v29 = vsel %vm862_vm12, 1.0, %v3967_v37  ;;  %v893_v30 = vsel %vm861_vm13, 1.0, %v3967_v37 }
  0xeb   : > { %v922_v32 = vpack.c.bf16 %v894_v29, %v893_v30 }
  0xec   : > { %v788_v33 = vpop.permute.xlu1 %787  ;;  %v785_v34 = vpop.permute.xlu0 %784 }
  0xed   : > { %vm864_vm14 = vcmp.eq.s32.totalorder %v4422_v25, %v788_v33  ;;  %vm863_vm0 = vcmp.eq.s32.totalorder %v4422_v25, %v785_v34  ;;  %3665 = vmatmul.mubr.msk.bf16.gmra.mrb[4].mxu1 %vm1143_vm15, %v922_v32  ;;  %v3878_v34 = vld [vmem:[%s5343_s4] ss:$8 sps:$4 sm:$0xff]  }
  0xee   : > { %v896_v35 = vsel %vm864_vm14, 1.0, %v3967_v37  ;;  %v895_v31 = vsel %vm863_vm0, 1.0, %v3967_v37 }
  0xef   : > { %v923_v36 = vpack.c.bf16 %v896_v35, %v895_v31  ;;  %v3880_v35 = vld [vmem:[%s5343_s4 + $0x4] ss:$8 sps:$4 sm:$0xff]   ;;  %v3883_v31 = vld [vmem:[%s5343_s4 + $0x14] ss:$8 sps:$4 sm:$0xff]  }
  0xf0   : > { %v794_v38 = vpop.permute.xlu1 %793  ;;  %v791_v40 = vpop.permute.xlu0 %790  ;;  %1671 = vmatprep.subr.bf16.mxu1 %v3880_v35 }
  0xf1   : > { %vm866_vm1 = vcmp.eq.s32.totalorder %v4422_v25, %v794_v38  ;;  %vm865_vm2 = vcmp.eq.s32.totalorder %v4422_v25, %v791_v40  ;;  %3668 = vmatprep.mubr.msk.bf16.mxu1 %vm1143_vm15, %v923_v36  ;;  %1672 = vmatpush1.bf16.msra.mxu1 %v3878_v34  ;;  %v3881_v36 = vld [vmem:[%s5343_s4 + $0x10] ss:$8 sps:$4 sm:$0xff]  }
  0xf2   : > { %v898_v41 = vsel %vm866_vm1, 1.0, %v3967_v37  ;;  %v897_v42 = vsel %vm865_vm2, 1.0, %v3967_v37  ;;  %1673 = vmatprep.subr.bf16.mxu1 %v3883_v31 }
  0xf3   : > { %v924_v43 = vpack.c.bf16 %v898_v41, %v897_v42  ;;  %v2127_v41 = vld [vmem:[%s5344_s5 + $0x10] sm:$0xff] }
  0xf4   : > { %v800_v44 = vpop.permute.xlu1 %799  ;;  %v797_v45 = vpop.permute.xlu0 %796 }
  0xf5   : > { %vm868_vm3 = vcmp.eq.s32.totalorder %v4422_v25, %v800_v44  ;;  %vm867_vm4 = vcmp.eq.s32.totalorder %v4422_v25, %v797_v45  ;;  %3669 = vmatmul.mubr.msk.bf16.gmra.mrb[8].mxu1 %vm1143_vm15, %v924_v43  ;;  %v3875_v45 = vld [vmem:[%s5344_s5] ss:$8 sps:$4 sm:$0xff]  }
  0xf6   : > { %v900_v46 = vsel %vm868_vm3, 1.0, %v3967_v37  ;;  %v899_v47 = vsel %vm867_vm4, 1.0, %v3967_v37  ;;  %1674 = vmatpush1.bf16.msra.mxu1 %v3881_v36 }
  0xf7   : > { %v925_v48 = vpack.c.bf16 %v900_v46, %v899_v47  ;;  %v3260_v47 = vcombine.high %v2127_v41, %v2127_v41 }
  0xf8   : > { %v806_v39 = vpop.permute.xlu1 %805  ;;  %v803_v50 = vpop.permute.xlu0 %802 }
  0xf9   : > { %vm870_vm5 = vcmp.eq.s32.totalorder %v4422_v25, %v806_v39  ;;  %vm869_vm6 = vcmp.eq.s32.totalorder %v4422_v25, %v803_v50  ;;  %3672 = vmatprep.mubr.msk.bf16.mxu1 %vm1143_vm15, %v925_v48  ;;  %v3259_v48 = vcombine.low %v2127_v41, %v2127_v41 }
  0xfa   : > { %v902_v51 = vsel %vm870_vm5, 1.0, %v3967_v37  ;;  %v901_v52 = vsel %vm869_vm6, 1.0, %v3967_v37 }
  0xfb   : > { %v926_v49 = vpack.c.bf16 %v902_v51, %v901_v52 }
  0xfc   : > { %v812_v53 = vpop.permute.xlu1 %811  ;;  %v809_v54 = vpop.permute.xlu0 %808 }
  0xfd   : > { %vm872_vm7 = vcmp.eq.s32.totalorder %v4422_v25, %v812_v53  ;;  %vm871_vm8 = vcmp.eq.s32.totalorder %v4422_v25, %v809_v54  ;;  %3673 = vmatmul.mubr.msk.bf16.gmra.mrb[12].mxu1 %vm1143_vm15, %v926_v49 }
  0xfe   : > { %v904_v56 = vsel %vm872_vm7, 1.0, %v3967_v37  ;;  %v903_v57 = vsel %vm871_vm8, 1.0, %v3967_v37  ;;  %vm2192_vm8 = vcmask 1043456  }
  0xff   : > { %v927_v58 = vpack.c.bf16 %v904_v56, %v903_v57  ;;  %v2194_v50 = vsel %vm2192_vm8, %v3259_v48, 0 }
 0x100   : > { %v818_v59 = vpop.permute.xlu1 %817  ;;  %v815_v16 = vpop.permute.xlu0 %814 }
 0x101   : > { %vm874_vm9 = vcmp.eq.s32.totalorder %v4422_v25, %v818_v59  ;;  %vm873_vm10 = vcmp.eq.s32.totalorder %v4422_v25, %v815_v16  ;;  %3676 = vmatprep.mubr.msk.bf16.mxu1 %vm1143_vm15, %v927_v58 }
 0x102   : > { %v906_v60 = vsel %vm874_vm9, 1.0, %v3967_v37  ;;  %v905_v19 = vsel %vm873_vm10, 1.0, %v3967_v37 }
 0x103   : > { %v928_v61 = vpack.c.bf16 %v906_v60, %v905_v19 }
 0x104   : > { %v824_v62 = vpop.permute.xlu1 %823  ;;  %v821_v63 = vpop.permute.xlu0 %820 }
 0x105   : > { %vm876_vm11 = vcmp.eq.s32.totalorder %v4422_v25, %v824_v62  ;;  %vm875_vm12 = vcmp.eq.s32.totalorder %v4422_v25, %v821_v63  ;;  %3677 = vmatmul.mubr.msk.bf16.gmra.mrb[16].mxu1 %vm1143_vm15, %v928_v61 }
 0x106   : > { %v908_v1 = vsel %vm876_vm11, 1.0, %v3967_v37  ;;  %v907_v2 = vsel %vm875_vm12, 1.0, %v3967_v37  ;;  %vm2143_vm11 = vcmask 195584  }
 0x107   : > { %v929_v3 = vpack.c.bf16 %v908_v1, %v907_v2 }
 0x108   : > { %v830_v5 = vpop.permute.xlu1 %829  ;;  %v827_v9 = vpop.permute.xlu0 %826 }
 0x109   : > { %vm878_vm13 = vcmp.eq.s32.totalorder %v4422_v25, %v830_v5  ;;  %vm877_vm14 = vcmp.eq.s32.totalorder %v4422_v25, %v827_v9  ;;  %3680 = vmatprep.mubr.msk.bf16.mxu1 %vm1143_vm15, %v929_v3 }
 0x10a   : > { %v910_v10 = vsel %vm878_vm13, 1.0, %v3967_v37  ;;  %v909_v11 = vsel %vm877_vm14, 1.0, %v3967_v37 }
 0x10b   : > { %v930_v12 = vpack.c.bf16 %v910_v10, %v909_v11 }
 0x10c   : > { %v836_v13 = vpop.permute.xlu1 %835  ;;  %v833_v14 = vpop.permute.xlu0 %832 }
 0x10d   : > { %vm880_vm0 = vcmp.eq.s32.totalorder %v4422_v25, %v836_v13  ;;  %vm879_vm1 = vcmp.eq.s32.totalorder %v4422_v25, %v833_v14  ;;  %3681 = vmatmul.mubr.msk.bf16.gmra.mrb[20].mxu1 %vm1143_vm15, %v930_v12 }
 0x10e   : > { %v912_v15 = vsel %vm880_vm0, 1.0, %v3967_v37  ;;  %v911_v20 = vsel %vm879_vm1, 1.0, %v3967_v37 }
 0x10f   : > { %v931_v7 = vpack.c.bf16 %v912_v15, %v911_v20 }
 0x110   : > { %v842_v18 = vpop.permute.xlu1 %841  ;;  %v839_v21 = vpop.permute.xlu0 %838 }
 0x111   : > { %vm882_vm2 = vcmp.eq.s32.totalorder %v4422_v25, %v842_v18  ;;  %vm881_vm3 = vcmp.eq.s32.totalorder %v4422_v25, %v839_v21  ;;  %3684 = vmatprep.mubr.msk.bf16.mxu1 %vm1143_vm15, %v931_v7 }
 0x112   : > { %v914_v8 = vsel %vm882_vm2, 1.0, %v3967_v37  ;;  %v913_v22 = vsel %vm881_vm3, 1.0, %v3967_v37 }
 0x113   : > { %v932_v24 = vpack.c.bf16 %v914_v8, %v913_v22 }
 0x114   : > { %v848_v26 = vpop.permute.xlu1 %847  ;;  %v845_v27 = vpop.permute.xlu0 %844 }
 0x115   : > { %vm884_vm4 = vcmp.eq.s32.totalorder %v4422_v25, %v848_v26  ;;  %vm883_vm5 = vcmp.eq.s32.totalorder %v4422_v25, %v845_v27  ;;  %3685 = vmatmul.mubr.msk.bf16.gmra.mrb[24].mxu1 %vm1143_vm15, %v932_v24 }
 0x116   : > { %v916_v0 = vsel %vm884_vm4, 1.0, %v3967_v37  ;;  %v915_v6 = vsel %vm883_vm5, 1.0, %v3967_v37 }
 0x117   : > { %v933_v23 = vpack.c.bf16 %v916_v0, %v915_v6 }
 0x118   : > { %v854_v28 = vpop.permute.xlu1 %853  ;;  %v851_v29 = vpop.permute.xlu0 %850 }
 0x119   : > { %vm886_vm6 = vcmp.eq.s32.totalorder %v4422_v25, %v854_v28  ;;  %vm885_vm7 = vcmp.eq.s32.totalorder %v4422_v25, %v851_v29  ;;  %3688 = vmatprep.mubr.msk.bf16.mxu1 %vm1143_vm15, %v933_v23 }
 0x11a   : > { %v918_v30 = vsel %vm886_vm6, 1.0, %v3967_v37  ;;  %v917_v32 = vsel %vm885_vm7, 1.0, %v3967_v37 }
 0x11b   : > { %v934_v33 = vpack.c.bf16 %v918_v30, %v917_v32 }
 0x11d   : > { %3689 = vmatmul.mubr.msk.bf16.gmra.mrb[28].mxu1 %vm1143_vm15, %v934_v33  ;;  %vm1622_vm15 = vcmask 261120  }
 0x11e   : > { %1703 = vmatprep.mubr.bf16.mxu1 %v5419_v4 }
 0x179   : > { %v3622_v38 = vpop.f32.mrb[0].mxu0 }
 0x17a   : > { %v1226_v40 = vpop.f32.mrb[1].mxu0 }
 0x17b   : > { %v3623_v42 = vpop.f32.mrb[2].mxu0 }
 0x17c   : > { %v1354_v43 = vpack.c.bf16 %v3623_v42, %v3622_v38  ;;  %v1229_v44 = vpop.f32.mrb[3].mxu0 }
 0x17d   : > { %v1353_v46 = vpack.c.bf16 %v1229_v44, %v1226_v40 }
 0x17f   : > { %3241 = vmatmul.mubr.msk.bf16.vlgmr.msra.gmra.mrb[32].mxu0 %vm1622_vm15, %v1353_v46 }
 0x180   : > { %2200 = vmatpush1.bf16.msra.mxu0 %v3875_v45  ;;  %1974 = vmatprep.mubr.bf16.mxu0 %v5419_v4 }
 0x181   : > { %v3626_v39 = vpop.f32.mrb[4].mxu0  ;;  %3261 = vmatprep.subr.msk.bf16.mxu0 %vm2192_vm8, %v3260_v47 }
 0x182   : > { %v1242_v51 = vpop.f32.mrb[5].mxu0 }
 0x183   : > { %v3627_v52 = vpop.f32.mrb[6].mxu0 }
 0x184   : > { %v1356_v49 = vpack.c.bf16 %v3627_v52, %v3626_v39  ;;  %v1245_v53 = vpop.f32.mrb[7].mxu0  ;;  %2202 = vmatpush1.bf16.msra.mxu0 %v2194_v50 }
 0x185   : > { %v1355_v54 = vpack.c.bf16 %v1245_v53, %v1242_v51 }
 0x187   : > { %3242 = vmatmul.mubr.msk.bf16.gmra.mrb[36].mxu0 %vm1622_vm15, %v1354_v43 }
 0x188   : > { %1984 = vmatprep.mubr.bf16.mxu0 %v5419_v4 }
 0x189   : > { %v3630_v55 = vpop.f32.mrb[8].mxu0 }
 0x18a   : > { %v1258_v56 = vpop.f32.mrb[9].mxu0 }
 0x18b   : > { %v3631_v57 = vpop.f32.mrb[10].mxu0 }
 0x18c   : > { %v1358_v58 = vpack.c.bf16 %v3631_v57, %v3630_v55  ;;  %v1261_v59 = vpop.f32.mrb[11].mxu0 }
 0x18d   : > { %v1357_v16 = vpack.c.bf16 %v1261_v59, %v1258_v56  ;;  %v3886_v56 = vld [vmem:[%s5346_s7 + $0x40] sm:$0xff]  }
 0x18e   : > { %3500 = vmatprep.subr.bf16.mxu1 %v3886_v56 }
 0x18f   : > { %3243 = vmatmul.mubr.msk.bf16.gmra.mrb[40].mxu0 %vm1622_vm15, %v1355_v54 }
 0x190   : > { %1994 = vmatprep.mubr.bf16.mxu0 %v5419_v4 }
 0x191   : > { %v3634_v60 = vpop.f32.mrb[12].mxu0 }
 0x192   : > { %v1274_v19 = vpop.f32.mrb[13].mxu0 }
 0x193   : > { %v3635_v61 = vpop.f32.mrb[14].mxu0 }
 0x194   : > { %v1360_v62 = vpack.c.bf16 %v3635_v61, %v3634_v60  ;;  %v1277_v63 = vpop.f32.mrb[15].mxu0 }
 0x195   : > { %v1359_v1 = vpack.c.bf16 %v1277_v63, %v1274_v19  ;;  %v3887_v19 = vld [vmem:[%s5346_s7] sm:$0xff]  }
 0x197   : > { %3244 = vmatmul.mubr.msk.bf16.gmra.mrb[44].mxu0 %vm1622_vm15, %v1356_v49 }
 0x198   : > { %2004 = vmatprep.mubr.bf16.mxu0 %v5419_v4 }
 0x199   : > { %v3638_v2 = vpop.f32.mrb[16].mxu0 }
 0x19a   : > { %v1290_v3 = vpop.f32.mrb[17].mxu0 }
 0x19b   : > { %v3639_v5 = vpop.f32.mrb[18].mxu0 }
 0x19c   : > { %v1362_v9 = vpack.c.bf16 %v3639_v5, %v3638_v2  ;;  %v1293_v10 = vpop.f32.mrb[19].mxu0 }
 0x19d   : > { %v1361_v11 = vpack.c.bf16 %v1293_v10, %v1290_v3 }
 0x19f   : > { %3245 = vmatmul.mubr.msk.bf16.gmra.mrb[48].mxu0 %vm1622_vm15, %v1357_v16 }
 0x1a0   : > { %2014 = vmatprep.mubr.bf16.mxu0 %v5419_v4 }
 0x1a1   : > { %v3642_v12 = vpop.f32.mrb[20].mxu0 }
 0x1a2   : > { %v1306_v13 = vpop.f32.mrb[21].mxu0 }
 0x1a3   : > { %v3643_v14 = vpop.f32.mrb[22].mxu0 }
 0x1a4   : > { %v1364_v15 = vpack.c.bf16 %v3643_v14, %v3642_v12  ;;  %v1309_v20 = vpop.f32.mrb[23].mxu0 }
 0x1a5   : > { %v1363_v7 = vpack.c.bf16 %v1309_v20, %v1306_v13 }
 0x1a7   : > { %3246 = vmatmul.mubr.msk.bf16.gmra.mrb[52].mxu0 %vm1622_vm15, %v1358_v58 }
 0x1a8   : > { %2024 = vmatprep.mubr.bf16.mxu0 %v5419_v4 }
 0x1a9   : > { %v4693_v18 = vpop.f32.mrb[24].mxu0 }
 0x1aa   : > { %v4695_v21 = vpop.f32.mrb[25].mxu0 }
 0x1ab   : > { %v4697_v8 = vpop.f32.mrb[26].mxu0 }
 0x1ac   : > { %v1366_v22 = vpack.c.bf16 %v4697_v8, %v4693_v18  ;;  %v1325_v24 = vpop.f32.mrb[27].mxu0 }
 0x1ad   : > { %v1365_v26 = vpack.c.bf16 %v1325_v24, %v4695_v21  ;;  %v937_v24 = vpop.permute.xlu0 %936 }
 0x1ae   : > { %vm1031_vm10 = vcmp.eq.s32.totalorder %v4422_v25, %v937_v24 }
 0x1af   : > { %3247 = vmatmul.mubr.msk.bf16.gmra.mrb[56].mxu0 %vm1622_vm15, %v1359_v1 }
 0x1b0   : > { %2034 = vmatprep.mubr.bf16.mxu0 %v5419_v4 }
 0x1b1   : > { %v4704_v27 = vpop.f32.mrb[28].mxu0 }
 0x1b2   : > { %v4706_v0 = vpop.f32.mrb[29].mxu0 }
 0x1b3   : > { %v4708_v6 = vpop.f32.mrb[30].mxu0 }
 0x1b4   : > { %v1368_v23 = vpack.c.bf16 %v4708_v6, %v4704_v27  ;;  %v4712_v28 = vpop.f32.mrb[31].mxu0  ;;  %v1063_v6 = vsel %vm1031_vm10, 1.0, %v3967_v37 }
 0x1b5   : > { %v1367_v29 = vpack.c.bf16 %v4712_v28, %v4706_v0  ;;  %v3890_v0 = vld [vmem:[%s5346_s7 + $0x50] sm:$0xff]  }
 0x1b6   : > { %v3891_v28 = vld [vmem:[%s5346_s7 + $0x10] sm:$0xff]  }
 0x1b7   : > { %3248 = vmatmul.mubr.msk.bf16.gmra.mrb[60].mxu0 %vm1622_vm15, %v1360_v62 }
 0x1b8   : > { %v3662_v30 = vpop.f32.mrb[0].mxu1  ;;  %2044 = vmatprep.mubr.bf16.mxu0 %v5419_v4 }
 0x1b9   : > { %v1451_v32 = vpop.f32.mrb[1].mxu1 }
 0x1ba   : > { %v3663_v33 = vpop.f32.mrb[2].mxu1 }
 0x1bb   : > { %v1579_v34 = vpack.c.bf16 %v3663_v33, %v3662_v30  ;;  %v1454_v35 = vpop.f32.mrb[3].mxu1  ;;  %v943_v30 = vpop.permute.xlu0 %942 }
 0x1bc   : > { %v1578_v31 = vpack.c.bf16 %v1454_v35, %v1451_v32  ;;  %v3893_v32 = vld [vmem:[%s5346_s7 + $0x18] sm:$0xff]   ;;  %vm1033_vm13 = vcmp.eq.s32.totalorder %v4422_v25, %v943_v30 }
 0x1bd   : > { %v1065_v35 = vsel %vm1033_vm13, 1.0, %v3967_v37 }
 0x1be   : > { %3221 = vmatmul.mubr.msk.bf16.vlgmr.msra.gmra.mrb[32].mxu1 %vm1622_vm15, %v1578_v31 }
 0x1bf   : > { %3249 = vmatmul.mubr.msk.bf16.gmra.mrb[64].mxu0 %vm1622_vm15, %v1361_v11  ;;  %1713 = vmatprep.mubr.bf16.mxu1 %v5419_v4 }
 0x1c0   : > { %v3666_v36 = vpop.f32.mrb[4].mxu1  ;;  %2054 = vmatprep.mubr.bf16.mxu0 %v5419_v4  ;;  %3501 = vmatpush3.bf16.msra.mxu1 %v3887_v19 }
 0x1c1   : > { %v1467_v38 = vpop.f32.mrb[5].mxu1 }
 0x1c2   : > { %v3667_v40 = vpop.f32.mrb[6].mxu1 }
 0x1c3   : > { %v1581_v41 = vpack.c.bf16 %v3667_v40, %v3666_v36  ;;  %v1470_v42 = vpop.f32.mrb[7].mxu1  ;;  %v949_v36 = vpop.permute.xlu0 %948 }
 0x1c4   : > { %v1580_v43 = vpack.c.bf16 %v1470_v42, %v1467_v38  ;;  %vm1035_vm0 = vcmp.eq.s32.totalorder %v4422_v25, %v949_v36 }
 0x1c6   : > { %3222 = vmatmul.mubr.msk.bf16.gmra.mrb[36].mxu1 %vm1622_vm15, %v1579_v34 }
 0x1c7   : > { %3250 = vmatmul.mubr.msk.bf16.gmra.mrb[68].mxu0 %vm1622_vm15, %v1362_v9  ;;  %1723 = vmatprep.mubr.bf16.mxu1 %v5419_v4  ;;  %v3888_v9 = vld [vmem:[%s5346_s7 + $0x48] sm:$0xff]  }
 0x1c8   : > { %v3670_v44 = vpop.f32.mrb[8].mxu1  ;;  %2064 = vmatprep.mubr.bf16.mxu0 %v5419_v4  ;;  %3502 = vmatprep.subr.bf16.mxu1 %v3888_v9 }
 0x1c9   : > { %v1483_v45 = vpop.f32.mrb[9].mxu1 }
 0x1ca   : > { %v3671_v46 = vpop.f32.mrb[10].mxu1 }
 0x1cb   : > { %v1583_v47 = vpack.c.bf16 %v3671_v46, %v3670_v44  ;;  %v1486_v48 = vpop.f32.mrb[11].mxu1 }
 0x1cc   : > { %v1582_v39 = vpack.c.bf16 %v1486_v48, %v1483_v45 }
 0x1ce   : > { %3223 = vmatmul.mubr.msk.bf16.gmra.mrb[40].mxu1 %vm1622_vm15, %v1580_v43  ;;  %v955_v43 = vpop.permute.xlu0 %954 }
 0x1cf   : > { %3251 = vmatmul.mubr.msk.bf16.gmra.mrb[72].mxu0 %vm1622_vm15, %v1363_v7  ;;  %1733 = vmatprep.mubr.bf16.mxu1 %v5419_v4  ;;  %vm1037_vm2 = vcmp.eq.s32.totalorder %v4422_v25, %v955_v43 }
 0x1d0   : > { %v3674_v50 = vpop.f32.mrb[12].mxu1  ;;  %2074 = vmatprep.mubr.bf16.mxu0 %v5419_v4  ;;  %v1069_v46 = vsel %vm1037_vm2, 1.0, %v3967_v37 }
 0x1d1   : > { %v1499_v51 = vpop.f32.mrb[13].mxu1 }
 0x1d2   : > { %v3675_v52 = vpop.f32.mrb[14].mxu1  ;;  %v961_v48 = vpop.permute.xlu0 %960 }
 0x1d3   : > { %v1585_v49 = vpack.c.bf16 %v3675_v52, %v3674_v50  ;;  %v1502_v53 = vpop.f32.mrb[15].mxu1  ;;  %vm1039_vm4 = vcmp.eq.s32.totalorder %v4422_v25, %v961_v48 }
 0x1d4   : > { %v1584_v54 = vpack.c.bf16 %v1502_v53, %v1499_v51  ;;  %v1071_v51 = vsel %vm1039_vm4, 1.0, %v3967_v37  ;;  %v3894_v53 = vld [vmem:[%s5346_s7 + $0x60] sm:$0xff]  }
 0x1d6   : > { %3224 = vmatmul.mubr.msk.bf16.gmra.mrb[44].mxu1 %vm1622_vm15, %v1581_v41  ;;  %v1067_v41 = vsel %vm1035_vm0, 1.0, %v3967_v37 }
 0x1d7   : > { %3252 = vmatmul.mubr.msk.bf16.gmra.mrb[76].mxu0 %vm1622_vm15, %v1364_v15  ;;  %1743 = vmatprep.mubr.bf16.mxu1 %v5419_v4  ;;  %v3889_v15 = vld [vmem:[%s5346_s7 + $0x8] sm:$0xff]  }
 0x1d8   : > { %v4733_v55 = vpop.f32.mrb[16].mxu1  ;;  %2084 = vmatprep.mubr.bf16.mxu0 %v5419_v4  ;;  %3503 = vmatpush3.bf16.msra.mxu1 %v3889_v15 }
 0x1d9   : > { %v4739_v57 = vpop.f32.mrb[17].mxu1  ;;  %3504 = vmatprep.subr.bf16.mxu1 %v3890_v0 }
 0x1da   : > { %v4741_v58 = vpop.f32.mrb[18].mxu1 }
 0x1db   : > { %v1587_v59 = vpack.c.bf16 %v4741_v58, %v4733_v55  ;;  %v1518_v16 = vpop.f32.mrb[19].mxu1 }
 0x1dc   : > { %v1586_v60 = vpack.c.bf16 %v1518_v16, %v4739_v57  ;;  %3505 = vmatpush3.bf16.msra.mxu1 %v3891_v28 }
 0x1de   : > { %3225 = vmatmul.mubr.msk.bf16.gmra.mrb[48].mxu1 %vm1622_vm15, %v1582_v39 }
 0x1df   : > { %3253 = vmatmul.mubr.msk.bf16.gmra.mrb[80].mxu0 %vm1622_vm15, %v1365_v26  ;;  %1753 = vmatprep.mubr.bf16.mxu1 %v5419_v4 }
 0x1e0   : > { %v4752_v61 = vpop.f32.mrb[20].mxu1  ;;  %2094 = vmatprep.mubr.bf16.mxu0 %v5419_v4 }
 0x1e1   : > { %v4755_v62 = vpop.f32.mrb[21].mxu1 }
 0x1e2   : > { %v4757_v63 = vpop.f32.mrb[22].mxu1 }
 0x1e3   : > { %v1589_v1 = vpack.c.bf16 %v4757_v63, %v4752_v61  ;;  %v4761_v2 = vpop.f32.mrb[23].mxu1  ;;  %v3896_v63 = vld [vmem:[%s5346_s7 + $0x68] sm:$0xff]  }
 0x1e4   : > { %v1588_v3 = vpack.c.bf16 %v4761_v2, %v4755_v62 }
 0x1e6   : > { %3226 = vmatmul.mubr.msk.bf16.gmra.mrb[52].mxu1 %vm1622_vm15, %v1583_v47 }
 0x1e7   : > { %3254 = vmatmul.mubr.msk.bf16.gmra.mrb[84].mxu0 %vm1622_vm15, %v1366_v22  ;;  %1763 = vmatprep.mubr.bf16.mxu1 %v5419_v4  ;;  %v940_v22 = vpop.permute.xlu1 %939 }
 0x1e8   : > { %v4771_v5 = vpop.f32.mrb[24].mxu1  ;;  %2104 = vmatprep.mubr.bf16.mxu0 %v5419_v4  ;;  %vm1032_vm9 = vcmp.eq.s32.totalorder %v4422_v25, %v940_v22 }
 0x1e9   : > { %v4777_v10 = vpop.f32.mrb[25].mxu1  ;;  %v1064_v27 = vsel %vm1032_vm9, 1.0, %v3967_v37 }
 0x1ea   : > { %v4779_v11 = vpop.f32.mrb[26].mxu1  ;;  %v1095_v33 = vpack.c.bf16 %v1064_v27, %v1063_v6  ;;  %v3900_v6 = vld [vmem:[%s5346_s7 + $0x78] sm:$0xff]  }
 0x1eb   : > { %v1591_v12 = vpack.c.bf16 %v4779_v11, %v4771_v5  ;;  %v4783_v13 = vpop.f32.mrb[27].mxu1 }
 0x1ec   : > { %v1590_v14 = vpack.c.bf16 %v4783_v13, %v4777_v10 }
 0x1ee   : > { %3227 = vmatmul.mubr.msk.bf16.gmra.mrb[56].mxu1 %vm1622_vm15, %v1584_v54  ;;  %v3895_v54 = vld [vmem:[%s5346_s7 + $0x20] sm:$0xff]  }
 0x1ef   : > { %3255 = vmatmul.mubr.msk.bf16.gmra.mrb[88].mxu0 %vm1622_vm15, %v1367_v29  ;;  %1773 = vmatprep.mubr.bf16.mxu1 %v5419_v4  ;;  %v3892_v29 = vld [vmem:[%s5346_s7 + $0x58] sm:$0xff]  }
 0x1f0   : > { %v4796_v20 = vpop.f32.mrb[28].mxu1  ;;  %2114 = vmatprep.mubr.bf16.mxu0 %v5419_v4  ;;  %3506 = vmatprep.subr.bf16.mxu1 %v3892_v29 }
 0x1f1   : > { %v4799_v7 = vpop.f32.mrb[29].mxu1  ;;  %3507 = vmatpush3.bf16.msra.mxu1 %v3893_v32 }
 0x1f2   : > { %v4801_v18 = vpop.f32.mrb[30].mxu1  ;;  %3508 = vmatprep.subr.bf16.mxu1 %v3894_v53 }
 0x1f3   : > { %v1593_v21 = vpack.c.bf16 %v4801_v18, %v4796_v20  ;;  %v4805_v8 = vpop.f32.mrb[31].mxu1  ;;  %v3898_v20 = vld [vmem:[%s5346_s7 + $0x70] sm:$0xff]  }
 0x1f4   : > { %v1592_v26 = vpack.c.bf16 %v4805_v8, %v4799_v7  ;;  %v3899_v7 = vld [vmem:[%s5346_s7 + $0x30] sm:$0xff]  }
 0x1f5   : > { %3509 = vmatpush3.bf16.msra.mxu1 %v3895_v54 }
 0x1f6   : > { %3228 = vmatmul.mubr.msk.bf16.gmra.mrb[60].mxu1 %vm1622_vm15, %v1585_v49  ;;  %v967_v49 = vpop.permute.xlu0 %966  ;;  %3510 = vmatprep.subr.bf16.mxu1 %v3896_v63 }
 0x1f7   : > { %3256 = vmatmul.mubr.msk.bf16.gmra.mrb[92].mxu0 %vm1622_vm15, %v1368_v23  ;;  %1783 = vmatprep.mubr.bf16.mxu1 %v5419_v4  ;;  %v946_v23 = vpop.permute.xlu1 %945  ;;  %vm1041_vm6 = vcmp.eq.s32.totalorder %v4422_v25, %v967_v49 }
 0x1f8   : > { %2231 = vmatprep.mubr.bf16.mxu0 %v5419_v4  ;;  %vm1034_vm12 = vcmp.eq.s32.totalorder %v4422_v25, %v946_v23  ;;  %v1073_v57 = vsel %vm1041_vm6, 1.0, %v3967_v37  ;;  %v3901_v23 = vld [vmem:[%s5346_s7 + $0x38] sm:$0xff]  }
 0x1f9   : > { %v1066_v34 = vsel %vm1034_vm12, 1.0, %v3967_v37 }
 0x1fa   : > { %v1096_v38 = vpack.c.bf16 %v1066_v34, %v1065_v35 }
 0x1fb   : > { %v952_v31 = vpop.permute.xlu1 %951 }
 0x1fc   : > { %vm1036_vm14 = vcmp.eq.s32.totalorder %v4422_v25, %v952_v31 }
 0x1fd   : > { %v1068_v40 = vsel %vm1036_vm14, 1.0, %v3967_v37 }
 0x1fe   : > { %3229 = vmatmul.mubr.msk.bf16.gmra.mrb[64].mxu1 %vm1622_vm15, %v1586_v60  ;;  %v1097_v44 = vpack.c.bf16 %v1068_v40, %v1067_v41 }
 0x1ff   : > { %3262 = vmatmul.mubr.msk.bf16.vlgmr.msra.gmra.mrb[32].mxu0 %vm2143_vm11, %v1095_v33  ;;  %1793 = vmatprep.mubr.bf16.mxu1 %v5419_v4  ;;  %v958_v42 = vpop.permute.xlu1 %957 }
 0x200   : > { %2241 = vmatprep.mubr.bf16.mxu0 %v5419_v4  ;;  %vm1038_vm1 = vcmp.eq.s32.totalorder %v4422_v25, %v958_v42 }
 0x201   : > { %v1070_v45 = vsel %vm1038_vm1, 1.0, %v3967_v37 }
 0x202   : > { %v1098_v39 = vpack.c.bf16 %v1070_v45, %v1069_v46 }
 0x203   : > { %v964_v47 = vpop.permute.xlu1 %963 }
 0x204   : > { %vm1040_vm3 = vcmp.eq.s32.totalorder %v4422_v25, %v964_v47 }
 0x205   : > { %v1072_v50 = vsel %vm1040_vm3, 1.0, %v3967_v37 }
 0x206   : > { %3230 = vmatmul.mubr.msk.bf16.gmra.mrb[68].mxu1 %vm1622_vm15, %v1587_v59  ;;  %v1099_v55 = vpack.c.bf16 %v1072_v50, %v1071_v51  ;;  %v973_v59 = vpop.permute.xlu0 %972 }
 0x207   : > { %3263 = vmatmul.mubr.msk.bf16.gmra.mrb[36].mxu0 %vm2143_vm11, %v1096_v38  ;;  %1803 = vmatprep.mubr.bf16.mxu1 %v5419_v4  ;;  %v970_v52 = vpop.permute.xlu1 %969  ;;  %vm1043_vm8 = vcmp.eq.s32.totalorder %v4422_v25, %v973_v59 }
 0x208   : > { %2251 = vmatprep.mubr.bf16.mxu0 %v5419_v4  ;;  %vm1042_vm5 = vcmp.eq.s32.totalorder %v4422_v25, %v970_v52  ;;  %v1075_v19 = vsel %vm1043_vm8, 1.0, %v3967_v37 }
 0x209   : > { %v1074_v56 = vsel %vm1042_vm5, 1.0, %v3967_v37 }
 0x20a   : > { %v1100_v16 = vpack.c.bf16 %v1074_v56, %v1073_v57  ;;  %v979_v62 = vpop.permute.xlu0 %978 }
 0x20b   : > { %v976_v58 = vpop.permute.xlu1 %975  ;;  %vm1045_vm10 = vcmp.eq.s32.totalorder %v4422_v25, %v979_v62 }
 0x20c   : > { %vm1044_vm7 = vcmp.eq.s32.totalorder %v4422_v25, %v976_v58  ;;  %v1077_v5 = vsel %vm1045_vm10, 1.0, %v3967_v37 }
 0x20d   : > { %v1076_v60 = vsel %vm1044_vm7, 1.0, %v3967_v37 }
 0x20e   : > { %3231 = vmatmul.mubr.msk.bf16.gmra.mrb[72].mxu1 %vm1622_vm15, %v1588_v3  ;;  %v1101_v2 = vpack.c.bf16 %v1076_v60, %v1075_v19  ;;  %v985_v10 = vpop.permute.xlu0 %984 }
 0x20f   : > { %3264 = vmatmul.mubr.msk.bf16.gmra.mrb[40].mxu0 %vm2143_vm11, %v1097_v44  ;;  %1813 = vmatprep.mubr.bf16.mxu1 %v5419_v4  ;;  %v982_v61 = vpop.permute.xlu1 %981  ;;  %vm1047_vm13 = vcmp.eq.s32.totalorder %v4422_v25, %v985_v10 }
 0x210   : > { %2261 = vmatprep.mubr.bf16.mxu0 %v5419_v4  ;;  %vm1046_vm9 = vcmp.eq.s32.totalorder %v4422_v25, %v982_v61  ;;  %v1079_v13 = vsel %vm1047_vm13, 1.0, %v3967_v37 }
 0x211   : > { %v1078_v3 = vsel %vm1046_vm9, 1.0, %v3967_v37 }
 0x212   : > { %v1102_v11 = vpack.c.bf16 %v1078_v3, %v1077_v5  ;;  %v991_v15 = vpop.permute.xlu0 %990 }
 0x213   : > { %v988_v9 = vpop.permute.xlu1 %987  ;;  %vm1049_vm14 = vcmp.eq.s32.totalorder %v4422_v25, %v991_v15 }
 0x214   : > { %vm1048_vm12 = vcmp.eq.s32.totalorder %v4422_v25, %v988_v9  ;;  %v1081_v8 = vsel %vm1049_vm14, 1.0, %v3967_v37 }
 0x216   : > { %3232 = vmatmul.mubr.msk.bf16.gmra.mrb[76].mxu1 %vm1622_vm15, %v1589_v1  ;;  %v3897_v1 = vld [vmem:[%s5346_s7 + $0x28] sm:$0xff]   ;;  %v997_v24 = vpop.permute.xlu0 %996 }
 0x217   : > { %3265 = vmatmul.mubr.msk.bf16.gmra.mrb[44].mxu0 %vm2143_vm11, %v1098_v39  ;;  %1823 = vmatprep.mubr.bf16.mxu1 %v5419_v4  ;;  %vm1051_vm1 = vcmp.eq.s32.totalorder %v4422_v25, %v997_v24 }
 0x218   : > { %2271 = vmatprep.mubr.bf16.mxu0 %v5419_v4  ;;  %3511 = vmatpush3.bf16.msra.mxu1 %v3897_v1  ;;  %v1083_v28 = vsel %vm1051_vm1, 1.0, %v3967_v37 }
 0x219   : > { %3512 = vmatprep.subr.bf16.mxu1 %v3898_v20 }
 0x21a   : > { %v1003_v27 = vpop.permute.xlu0 %1002 }
 0x21b   : > { %vm1053_vm3 = vcmp.eq.s32.totalorder %v4422_v25, %v1003_v27 }
 0x21c   : > { %3513 = vmatpush3.bf16.msra.mxu1 %v3899_v7  ;;  %v1085_v33 = vsel %vm1053_vm3, 1.0, %v3967_v37 }
 0x21d   : > { %3514 = vmatprep.subr.bf16.mxu1 %v3900_v6 }
 0x21e   : > { %3233 = vmatmul.mubr.msk.bf16.gmra.mrb[80].mxu1 %vm1622_vm15, %v1590_v14  ;;  %v994_v14 = vpop.permute.xlu1 %993  ;;  %v1009_v35 = vpop.permute.xlu0 %1008 }
 0x21f   : > { %3266 = vmatmul.mubr.msk.bf16.gmra.mrb[48].mxu0 %vm2143_vm11, %v1099_v55  ;;  %1833 = vmatprep.mubr.bf16.mxu1 %v5419_v4  ;;  %vm1055_vm5 = vcmp.eq.s32.totalorder %v4422_v25, %v1009_v35 }
 0x220   : > { %2281 = vmatprep.mubr.bf16.mxu0 %v5419_v4  ;;  %3515 = vmatpush3.bf16.msra.mxu1 %v3901_v23  ;;  %v1087_v38 = vsel %vm1055_vm5, 1.0, %v3967_v37 }
 0x222   : > { %v1000_v22 = vpop.permute.xlu1 %999  ;;  %v1015_v41 = vpop.permute.xlu0 %1014 }
 0x223   : > { %vm1052_vm0 = vcmp.eq.s32.totalorder %v4422_v25, %v1000_v22  ;;  %vm1057_vm7 = vcmp.eq.s32.totalorder %v4422_v25, %v1015_v41 }
 0x224   : > { %v1084_v0 = vsel %vm1052_vm0, 1.0, %v3967_v37  ;;  %v1089_v44 = vsel %vm1057_vm7, 1.0, %v3967_v37 }
 0x225   : > { %v1105_v30 = vpack.c.bf16 %v1084_v0, %v1083_v28  ;;  %v2456_v28 = vld [vmem:[%s5345_s6] sm:$0x3] }
 0x226   : > { %3234 = vmatmul.mubr.msk.bf16.gmra.mrb[84].mxu1 %vm1622_vm15, %v1591_v12  ;;  %v1080_v12 = vsel %vm1048_vm12, 1.0, %v3967_v37  ;;  %v1006_v29 = vpop.permute.xlu1 %1005  ;;  %v1021_v46 = vpop.permute.xlu0 %1020 }
 0x227   : > { %3267 = vmatmul.mubr.msk.bf16.gmra.mrb[52].mxu0 %vm2143_vm11, %v1100_v16  ;;  %1843 = vmatprep.mubr.bf16.mxu1 %v5419_v4  ;;  %v1103_v18 = vpack.c.bf16 %v1080_v12, %v1079_v13  ;;  %vm1054_vm2 = vcmp.eq.s32.totalorder %v4422_v25, %v1006_v29  ;;  %vm1059_vm9 = vcmp.eq.s32.totalorder %v4422_v25, %v1021_v46 }
 0x228   : > { %2291 = vmatprep.mubr.bf16.mxu0 %v5419_v4  ;;  %v1086_v32 = vsel %vm1054_vm2, 1.0, %v3967_v37  ;;  %v1091_v39 = vsel %vm1059_vm9, 1.0, %v3967_v37 }
 0x229   : > { %v1106_v31 = vpack.c.bf16 %v1086_v32, %v1085_v33 }
 0x22a   : > { %v1012_v34 = vpop.permute.xlu1 %1011  ;;  %v1027_v51 = vpop.permute.xlu0 %1026 }
 0x22b   : > { %vm1056_vm4 = vcmp.eq.s32.totalorder %v4422_v25, %v1012_v34  ;;  %vm1061_vm12 = vcmp.eq.s32.totalorder %v4422_v25, %v1027_v51 }
 0x22c   : > { %v1088_v36 = vsel %vm1056_vm4, 1.0, %v3967_v37  ;;  %v1093_v53 = vsel %vm1061_vm12, 1.0, %v3967_v37 }
 0x22d   : > { %v1107_v42 = vpack.c.bf16 %v1088_v36, %v1087_v38 }
 0x22e   : > { %3235 = vmatmul.mubr.msk.bf16.gmra.mrb[88].mxu1 %vm1622_vm15, %v1592_v26  ;;  %v1018_v40 = vpop.permute.xlu1 %1017 }
 0x22f   : > { %3268 = vmatmul.mubr.msk.bf16.gmra.mrb[56].mxu0 %vm2143_vm11, %v1101_v2  ;;  %1853 = vmatprep.mubr.bf16.mxu1 %v5419_v4  ;;  %vm1058_vm6 = vcmp.eq.s32.totalorder %v4422_v25, %v1018_v40 }
 0x230   : > { %2301 = vmatprep.mubr.bf16.mxu0 %v5419_v4  ;;  %v1090_v43 = vsel %vm1058_vm6, 1.0, %v3967_v37 }
 0x231   : > { %v1108_v47 = vpack.c.bf16 %v1090_v43, %v1089_v44 }
 0x232   : > { %v1024_v45 = vpop.permute.xlu1 %1023 }
 0x233   : > { %vm1060_vm8 = vcmp.eq.s32.totalorder %v4422_v25, %v1024_v45 }
 0x234   : > { %v1092_v48 = vsel %vm1060_vm8, 1.0, %v3967_v37 }
 0x235   : > { %v1109_v52 = vpack.c.bf16 %v1092_v48, %v1091_v39 }
 0x236   : > { %3236 = vmatmul.mubr.msk.bf16.gmra.mrb[92].mxu1 %vm1622_vm15, %v1593_v21  ;;  %vm1050_vm15 = vcmp.eq.s32.totalorder %v4422_v25, %v994_v14  ;;  %v1030_v50 = vpop.permute.xlu1 %1029 }
 0x237   : > { %3269 = vmatmul.mubr.msk.bf16.gmra.mrb[60].mxu0 %vm2143_vm11, %v1102_v11  ;;  %v1082_v21 = vsel %vm1050_vm15, 1.0, %v3967_v37  ;;  %vm1062_vm10 = vcmp.eq.s32.totalorder %v4422_v25, %v1030_v50 }
 0x238   : > { %2311 = vmatprep.mubr.bf16.mxu0 %v5419_v4  ;;  %v1104_v26 = vpack.c.bf16 %v1082_v21, %v1081_v8  ;;  %v1094_v49 = vsel %vm1062_vm10, 1.0, %v3967_v37  ;;  %v2459_v8 = vshrl.u32 %v581_v17, 7 }
 0x239   : > { %v1110_v54 = vpack.c.bf16 %v1094_v49, %v1093_v53 }
 0x23a   : > { %v2460_v0 = vsub.s32 0, %v2459_v8  ;;  %v2464_v29 = vsub.s32 1, %v2459_v8 }
 0x23c   : > { %v5041_v6 = vrot.slane %v2456_v28, %v2460_v0  ;;  %v5045_v17 = vrot.slane %v2456_v28, %v2464_v29 }
 0x23f   : > { %3270 = vmatmul.mubr.msk.bf16.gmra.mrb[64].mxu0 %vm2143_vm11, %v1103_v18 }
 0x240   : > { %2321 = vmatprep.mubr.bf16.mxu0 %v5419_v4 }
 0x247   : > { %3271 = vmatmul.mubr.msk.bf16.gmra.mrb[68].mxu0 %vm2143_vm11, %v1104_v26 }
 0x248   : > { %2331 = vmatprep.mubr.bf16.mxu0 %v5419_v4 }
 0x24f   : > { %3272 = vmatmul.mubr.msk.bf16.gmra.mrb[72].mxu0 %vm2143_vm11, %v1105_v30 }
 0x250   : > { %2341 = vmatprep.mubr.bf16.mxu0 %v5419_v4 }
 0x257   : > { %3273 = vmatmul.mubr.msk.bf16.gmra.mrb[76].mxu0 %vm2143_vm11, %v1106_v31 }
 0x258   : > { %2351 = vmatprep.mubr.bf16.mxu0 %v5419_v4 }
 0x25f   : > { %3274 = vmatmul.mubr.msk.bf16.gmra.mrb[80].mxu0 %vm2143_vm11, %v1107_v42 }
 0x260   : > { %2361 = vmatprep.mubr.bf16.mxu0 %v5419_v4 }
 0x267   : > { %3275 = vmatmul.mubr.msk.bf16.gmra.mrb[84].mxu0 %vm2143_vm11, %v1108_v47 }
 0x268   : > { %2371 = vmatprep.mubr.bf16.mxu0 %v5419_v4 }
 0x26f   : > { %3276 = vmatmul.mubr.msk.bf16.gmra.mrb[88].mxu0 %vm2143_vm11, %v1109_v52 }
 0x270   : > { %2381 = vmatprep.mubr.bf16.mxu0 %v5419_v4 }
 0x277   : > { %3277 = vmatmul.mubr.msk.bf16.gmra.mrb[92].mxu0 %vm2143_vm11, %v1110_v54 }
 0x291   : > { %v1705_v55 = vpop.f32.mrb[32].mxu1 }
 0x292   : > { %v1707_v56 = vpop.f32.mrb[33].mxu1 }
 0x293   : > { %v1709_v57 = vpop.f32.mrb[34].mxu1 }
 0x294   : > { %v1711_v58 = vpop.f32.mrb[35].mxu1 }
 0x299   : > { %v1715_v59 = vpop.f32.mrb[36].mxu1 }
 0x29a   : > { %v1717_v16 = vpop.f32.mrb[37].mxu1 }
 0x29b   : > { %v4983_v60 = vpop.f32.mrb[38].mxu1 }
 0x29c   : > { %v4985_v25 = vpop.f32.mrb[39].mxu1 }
 0x2a1   : > { %v4987_v19 = vpop.f32.mrb[40].mxu1 }
 0x2a2   : > { %v4989_v4 = vpop.f32.mrb[41].mxu1 }
 0x2a3   : > { %v4991_v61 = vpop.f32.mrb[42].mxu1 }
 0x2a4   : > { %v4993_v37 = vpop.f32.mrb[43].mxu1 }
 0x2a9   : > { %v4995_v62 = vpop.f32.mrb[44].mxu1 }
 0x2aa   : > { %v4997_v63 = vpop.f32.mrb[45].mxu1 }
 0x2ab   : > { %v4999_v1 = vpop.f32.mrb[46].mxu1 }
 0x2ac   : > { %v5001_v2 = vpop.f32.mrb[47].mxu1 }
 0x2b1   : > { %v5003_v3 = vpop.f32.mrb[48].mxu1 }
 0x2b2   : > { %v5005_v5 = vpop.f32.mrb[49].mxu1 }
 0x2b3   : > { %v5007_v9 = vpop.f32.mrb[50].mxu1 }
 0x2b4   : > { %v5009_v10 = vpop.f32.mrb[51].mxu1 }
 0x2b9   : > { %v5011_v11 = vpop.f32.mrb[52].mxu1 }
 0x2ba   : > { %v5013_v12 = vpop.f32.mrb[53].mxu1 }
 0x2bb   : > { %v5015_v13 = vpop.f32.mrb[54].mxu1 }
 0x2bc   : > { %v5017_v14 = vpop.f32.mrb[55].mxu1 }
 0x2c1   : > { %v5019_v15 = vpop.f32.mrb[56].mxu1 }
 0x2c2   : > { %v5021_v20 = vpop.f32.mrb[57].mxu1 }
 0x2c3   : > { %v5023_v7 = vpop.f32.mrb[58].mxu1 }
 0x2c4   : > { %v5025_v18 = vpop.f32.mrb[59].mxu1 }
 0x2c9   : > { %v5027_v21 = vpop.f32.mrb[60].mxu1 }
 0x2ca   : > { %v5030_v22 = vpop.f32.mrb[61].mxu1 }
 0x2cb   : > { %v5032_v24 = vpop.f32.mrb[62].mxu1 }
 0x2cc   : > { %v5034_v26 = vpop.f32.mrb[63].mxu1 }
 0x2d1   : > { %v5039_v27 = vpop.f32.mrb[64].mxu1 }
 0x2d2   : > { %v5043_v23 = vpop.f32.mrb[65].mxu1  ;;  %v2233_v30 = vpop.f32.mrb[32].mxu0 }
 0x2d3   : > { %v3692_v32 = vadd.f32 %v2233_v30, %v1705_v55  ;;  %v5047_v33 = vpop.f32.mrb[66].mxu1  ;;  %v2235_v34 = vpop.f32.mrb[33].mxu0 }
 0x2d4   : > { %v3693_v35 = vadd.f32 %v2235_v34, %v1707_v56  ;;  %v5049_v31 = vpop.f32.mrb[67].mxu1  ;;  %v2237_v36 = vpop.f32.mrb[34].mxu0 }
 0x2d5   : > { %v2468_v38 = vadd.f32 %v3692_v32, %v5041_v6  ;;  %v3694_v40 = vadd.f32 %v2237_v36, %v1709_v57  ;;  %v2239_v41 = vpop.f32.mrb[35].mxu0 }
 0x2d6   : > { %v2469_v42 = vadd.f32 %v3693_v35, %v5045_v17  ;;  %v3695_v43 = vadd.f32 %v2239_v41, %v1711_v58 }
 0x2d7   : > { %v2470_v44 = vadd.f32 %v3694_v40, %v5041_v6  ;;  %v2532_v46 = vmax.f32 %v2468_v38, 0.0 }
 0x2d8   : > { %v2471_v45 = vadd.f32 %v3695_v43, %v5045_v17  ;;  %v2533_v39 = vmax.f32 %v2469_v42, 0.0 }
 0x2d9   : > { %v2534_v47 = vmax.f32 %v2470_v44, 0.0  ;;  %v5055_v48 = vpop.f32.mrb[68].mxu1 }
 0x2da   : > { %v2535_v50 = vmax.f32 %v2471_v45, 0.0  ;;  %v5057_v51 = vpop.f32.mrb[69].mxu1  ;;  %v2243_v52 = vpop.f32.mrb[36].mxu0 }
 0x2db   : > { %v2596_v49 = vpack.c.bf16 %v2534_v47, %v2532_v46  ;;  %v3696_v53 = vadd.f32 %v2243_v52, %v1715_v59  ;;  %v5059_v54 = vpop.f32.mrb[70].mxu1  ;;  %v2245_v55 = vpop.f32.mrb[37].mxu0 }
 0x2dc   : > { %v3697_v56 = vadd.f32 %v2245_v55, %v1717_v16  ;;  %v5061_v57 = vpop.f32.mrb[71].mxu1  ;;  %v2247_v58 = vpop.f32.mrb[38].mxu0  ;;  %v2597_v8 = vpack.c.bf16 %v2535_v50, %v2533_v39 }
 0x2dd   : > { %v2472_v0 = vadd.f32 %v3696_v53, %v5041_v6  ;;  %v3698_v28 = vadd.f32 %v2247_v58, %v4983_v60  ;;  %v2249_v29 = vpop.f32.mrb[39].mxu0 }
 0x2de   : > { %v2473_v30 = vadd.f32 %v3697_v56, %v5045_v17  ;;  %v3699_v32 = vadd.f32 %v2249_v29, %v4985_v25  ;;  %2795 = vmatprep.mubr.bf16.mxu1 %v2597_v8 }
 0x2df   : > { %v2474_v59 = vadd.f32 %v3698_v28, %v5041_v6  ;;  %2796 = vmatmul.mubr.bf16.vlgmr.msra.gmra.mrb[96].mxu1 %v2596_v49  ;;  %v2536_v16 = vmax.f32 %v2472_v0, 0.0 }
 0x2e0   : > { %v2475_v34 = vadd.f32 %v3699_v32, %v5045_v17  ;;  %v2537_v38 = vmax.f32 %v2473_v30, 0.0 }
 0x2e1   : > { %v2538_v35 = vmax.f32 %v2474_v59, 0.0  ;;  %v5069_v36 = vpop.f32.mrb[72].mxu1 }
 0x2e2   : > { %v2539_v40 = vmax.f32 %v2475_v34, 0.0  ;;  %v5071_v41 = vpop.f32.mrb[73].mxu1  ;;  %v2253_v60 = vpop.f32.mrb[40].mxu0 }
 0x2e3   : > { %v3700_v42 = vadd.f32 %v2253_v60, %v4987_v19  ;;  %v5074_v43 = vpop.f32.mrb[74].mxu1  ;;  %v2255_v25 = vpop.f32.mrb[41].mxu0  ;;  %v2598_v44 = vpack.c.bf16 %v2538_v35, %v2536_v16 }
 0x2e4   : > { %v3701_v45 = vadd.f32 %v2255_v25, %v4989_v4  ;;  %v5077_v46 = vpop.f32.mrb[75].mxu1  ;;  %v2257_v47 = vpop.f32.mrb[42].mxu0  ;;  %v2599_v39 = vpack.c.bf16 %v2539_v40, %v2537_v38 }
 0x2e5   : > { %v2476_v50 = vadd.f32 %v3700_v42, %v5041_v6  ;;  %v3702_v52 = vadd.f32 %v2257_v47, %v4991_v61  ;;  %v2259_v49 = vpop.f32.mrb[43].mxu0 }
 0x2e6   : > { %v2477_v53 = vadd.f32 %v3701_v45, %v5045_v17  ;;  %v3703_v55 = vadd.f32 %v2259_v49, %v4993_v37  ;;  %2803 = vmatprep.mubr.bf16.mxu1 %v2599_v39 }
 0x2e7   : > { %v2478_v19 = vadd.f32 %v3702_v52, %v5041_v6  ;;  %2804 = vmatmul.mubr.bf16.gmra.mrb[100].mxu1 %v2598_v44  ;;  %v2540_v4 = vmax.f32 %v2476_v50, 0.0 }
 0x2e8   : > { %v2479_v56 = vadd.f32 %v3703_v55, %v5045_v17  ;;  %v2541_v0 = vmax.f32 %v2477_v53, 0.0 }
 0x2e9   : > { %v2542_v58 = vmax.f32 %v2478_v19, 0.0  ;;  %v5085_v8 = vpop.f32.mrb[76].mxu1 }
 0x2ea   : > { %v2543_v28 = vmax.f32 %v2479_v56, 0.0  ;;  %v5087_v29 = vpop.f32.mrb[77].mxu1  ;;  %v2263_v61 = vpop.f32.mrb[44].mxu0 }
 0x2eb   : > { %v3704_v30 = vadd.f32 %v2263_v61, %v4995_v62  ;;  %v5090_v32 = vpop.f32.mrb[78].mxu1  ;;  %v2265_v37 = vpop.f32.mrb[45].mxu0  ;;  %v2600_v59 = vpack.c.bf16 %v2542_v58, %v2540_v4 }
 0x2ec   : > { %v3705_v34 = vadd.f32 %v2265_v37, %v4997_v63  ;;  %v5093_v16 = vpop.f32.mrb[79].mxu1  ;;  %v2267_v35 = vpop.f32.mrb[46].mxu0  ;;  %v2601_v38 = vpack.c.bf16 %v2543_v28, %v2541_v0 }
 0x2ed   : > { %v2480_v40 = vadd.f32 %v3704_v30, %v5041_v6  ;;  %v3706_v60 = vadd.f32 %v2267_v35, %v4999_v1  ;;  %v2269_v42 = vpop.f32.mrb[47].mxu0 }
 0x2ee   : > { %v2481_v25 = vadd.f32 %v3705_v34, %v5045_v17  ;;  %v3707_v44 = vadd.f32 %v2269_v42, %v5001_v2  ;;  %2811 = vmatprep.mubr.bf16.mxu1 %v2601_v38 }
 0x2ef   : > { %v2482_v62 = vadd.f32 %v3706_v60, %v5041_v6  ;;  %2812 = vmatmul.mubr.bf16.gmra.mrb[104].mxu1 %v2600_v59  ;;  %v2544_v63 = vmax.f32 %v2480_v40, 0.0 }
 0x2f0   : > { %v2483_v45 = vadd.f32 %v3707_v44, %v5045_v17  ;;  %v2545_v50 = vmax.f32 %v2481_v25, 0.0 }
 0x2f1   : > { %v2546_v47 = vmax.f32 %v2482_v62, 0.0  ;;  %v5101_v39 = vpop.f32.mrb[80].mxu1 }
 0x2f2   : > { %v2547_v52 = vmax.f32 %v2483_v45, 0.0  ;;  %v5103_v49 = vpop.f32.mrb[81].mxu1  ;;  %v2273_v1 = vpop.f32.mrb[48].mxu0 }
 0x2f3   : > { %v3708_v53 = vadd.f32 %v2273_v1, %v5003_v3  ;;  %v5106_v55 = vpop.f32.mrb[82].mxu1  ;;  %v2275_v2 = vpop.f32.mrb[49].mxu0  ;;  %v2602_v19 = vpack.c.bf16 %v2546_v47, %v2544_v63 }
 0x2f4   : > { %v3709_v56 = vadd.f32 %v2275_v2, %v5005_v5  ;;  %v5109_v4 = vpop.f32.mrb[83].mxu1  ;;  %v2277_v58 = vpop.f32.mrb[50].mxu0  ;;  %v2603_v0 = vpack.c.bf16 %v2547_v52, %v2545_v50 }
 0x2f5   : > { %v2484_v28 = vadd.f32 %v3708_v53, %v5041_v6  ;;  %v3710_v61 = vadd.f32 %v2277_v58, %v5007_v9  ;;  %v2279_v30 = vpop.f32.mrb[51].mxu0 }
 0x2f6   : > { %v2485_v37 = vadd.f32 %v3709_v56, %v5045_v17  ;;  %v3711_v59 = vadd.f32 %v2279_v30, %v5009_v10  ;;  %2819 = vmatprep.mubr.bf16.mxu1 %v2603_v0 }
 0x2f7   : > { %v2486_v3 = vadd.f32 %v3710_v61, %v5041_v6  ;;  %2820 = vmatmul.mubr.bf16.gmra.mrb[108].mxu1 %v2602_v19  ;;  %v2548_v5 = vmax.f32 %v2484_v28, 0.0 }
 0x2f8   : > { %v2487_v34 = vadd.f32 %v3711_v59, %v5045_v17  ;;  %v2549_v40 = vmax.f32 %v2485_v37, 0.0 }
 0x2f9   : > { %v2550_v35 = vmax.f32 %v2486_v3, 0.0  ;;  %v5117_v38 = vpop.f32.mrb[84].mxu1 }
 0x2fa   : > { %v2551_v60 = vmax.f32 %v2487_v34, 0.0  ;;  %v5119_v42 = vpop.f32.mrb[85].mxu1  ;;  %v2283_v9 = vpop.f32.mrb[52].mxu0 }
 0x2fb   : > { %v3712_v25 = vadd.f32 %v2283_v9, %v5011_v11  ;;  %v5122_v44 = vpop.f32.mrb[86].mxu1  ;;  %v2285_v10 = vpop.f32.mrb[53].mxu0  ;;  %v2604_v62 = vpack.c.bf16 %v2550_v35, %v2548_v5 }
 0x2fc   : > { %v3713_v45 = vadd.f32 %v2285_v10, %v5013_v12  ;;  %v5125_v63 = vpop.f32.mrb[87].mxu1  ;;  %v2287_v47 = vpop.f32.mrb[54].mxu0  ;;  %v2605_v50 = vpack.c.bf16 %v2551_v60, %v2549_v40 }
 0x2fd   : > { %v2488_v52 = vadd.f32 %v3712_v25, %v5041_v6  ;;  %v3714_v1 = vadd.f32 %v2287_v47, %v5015_v13  ;;  %v2289_v53 = vpop.f32.mrb[55].mxu0 }
 0x2fe   : > { %v2489_v2 = vadd.f32 %v3713_v45, %v5045_v17  ;;  %v3715_v19 = vadd.f32 %v2289_v53, %v5017_v14  ;;  %2827 = vmatprep.mubr.bf16.mxu1 %v2605_v50 }
 0x2ff   : > { %v2490_v11 = vadd.f32 %v3714_v1, %v5041_v6  ;;  %2828 = vmatmul.mubr.bf16.gmra.mrb[112].mxu1 %v2604_v62  ;;  %v2552_v12 = vmax.f32 %v2488_v52, 0.0 }
 0x300   : > { %v2491_v56 = vadd.f32 %v3715_v19, %v5045_v17  ;;  %v2553_v28 = vmax.f32 %v2489_v2, 0.0 }
 0x301   : > { %v2554_v58 = vmax.f32 %v2490_v11, 0.0  ;;  %v5133_v0 = vpop.f32.mrb[88].mxu1 }
 0x302   : > { %v2555_v61 = vmax.f32 %v2491_v56, 0.0  ;;  %v5135_v30 = vpop.f32.mrb[89].mxu1  ;;  %v2293_v13 = vpop.f32.mrb[56].mxu0 }
 0x303   : > { %v3716_v37 = vadd.f32 %v2293_v13, %v5019_v15  ;;  %v5138_v59 = vpop.f32.mrb[90].mxu1  ;;  %v2295_v14 = vpop.f32.mrb[57].mxu0  ;;  %v2606_v3 = vpack.c.bf16 %v2554_v58, %v2552_v12 }
 0x304   : > { %v3717_v34 = vadd.f32 %v2295_v14, %v5021_v20  ;;  %v5141_v5 = vpop.f32.mrb[91].mxu1  ;;  %v2297_v35 = vpop.f32.mrb[58].mxu0  ;;  %v2607_v40 = vpack.c.bf16 %v2555_v61, %v2553_v28 }
 0x305   : > { %v2492_v60 = vadd.f32 %v3716_v37, %v5041_v6  ;;  %v3718_v9 = vadd.f32 %v2297_v35, %v5023_v7  ;;  %v2299_v25 = vpop.f32.mrb[59].mxu0 }
 0x306   : > { %v2493_v10 = vadd.f32 %v3717_v34, %v5045_v17  ;;  %v3719_v62 = vadd.f32 %v2299_v25, %v5025_v18  ;;  %2835 = vmatprep.mubr.bf16.mxu1 %v2607_v40 }
 0x307   : > { %v2494_v15 = vadd.f32 %v3718_v9, %v5041_v6  ;;  %2836 = vmatmul.mubr.bf16.gmra.mrb[116].mxu1 %v2606_v3  ;;  %v2556_v20 = vmax.f32 %v2492_v60, 0.0 }
 0x308   : > { %v2495_v45 = vadd.f32 %v3719_v62, %v5045_v17  ;;  %v2557_v52 = vmax.f32 %v2493_v10, 0.0 }
 0x309   : > { %v2558_v47 = vmax.f32 %v2494_v15, 0.0  ;;  %v5149_v50 = vpop.f32.mrb[92].mxu1 }
 0x30a   : > { %v2559_v1 = vmax.f32 %v2495_v45, 0.0  ;;  %v5151_v53 = vpop.f32.mrb[93].mxu1  ;;  %v2303_v7 = vpop.f32.mrb[60].mxu0 }
 0x30b   : > { %v3720_v2 = vadd.f32 %v2303_v7, %v5027_v21  ;;  %v5154_v19 = vpop.f32.mrb[94].mxu1  ;;  %v2305_v18 = vpop.f32.mrb[61].mxu0  ;;  %v2608_v11 = vpack.c.bf16 %v2558_v47, %v2556_v20 }
 0x30c   : > { %v3721_v56 = vadd.f32 %v2305_v18, %v5030_v22  ;;  %v5157_v12 = vpop.f32.mrb[95].mxu1  ;;  %v2307_v58 = vpop.f32.mrb[62].mxu0  ;;  %v2609_v28 = vpack.c.bf16 %v2559_v1, %v2557_v52 }
 0x30d   : > { %v2496_v61 = vadd.f32 %v3720_v2, %v5041_v6  ;;  %v3722_v13 = vadd.f32 %v2307_v58, %v5032_v24  ;;  %v2309_v37 = vpop.f32.mrb[63].mxu0 }
 0x30e   : > { %v2497_v14 = vadd.f32 %v3721_v56, %v5045_v17  ;;  %v3723_v3 = vadd.f32 %v2309_v37, %v5034_v26  ;;  %2843 = vmatprep.mubr.bf16.mxu1 %v2609_v28 }
 0x30f   : > { %v2498_v21 = vadd.f32 %v3722_v13, %v5041_v6  ;;  %2844 = vmatmul.mubr.bf16.gmra.mrb[120].mxu1 %v2608_v11  ;;  %v2560_v22 = vmax.f32 %v2496_v61, 0.0 }
 0x310   : > { %v2499_v34 = vadd.f32 %v3723_v3, %v5045_v17  ;;  %v2561_v40 = vmax.f32 %v2497_v14, 0.0 }
 0x311   : > { %v2562_v35 = vmax.f32 %v2498_v21, 0.0 }
 0x312   : > { %v2563_v60 = vmax.f32 %v2499_v34, 0.0  ;;  %v2313_v9 = vpop.f32.mrb[64].mxu0 }
 0x313   : > { %v3724_v25 = vadd.f32 %v2313_v9, %v5039_v27  ;;  %v2315_v10 = vpop.f32.mrb[65].mxu0  ;;  %v2610_v24 = vpack.c.bf16 %v2562_v35, %v2560_v22 }
 0x314   : > { %v3725_v62 = vadd.f32 %v2315_v10, %v5043_v23  ;;  %v2317_v15 = vpop.f32.mrb[66].mxu0  ;;  %v2611_v45 = vpack.c.bf16 %v2563_v60, %v2561_v40 }
 0x315   : > { %v2500_v26 = vadd.f32 %v3724_v25, %v5041_v6  ;;  %v3726_v20 = vadd.f32 %v2317_v15, %v5047_v33  ;;  %v2319_v47 = vpop.f32.mrb[67].mxu0 }
 0x316   : > { %v2501_v52 = vadd.f32 %v3725_v62, %v5045_v17  ;;  %v3727_v1 = vadd.f32 %v2319_v47, %v5049_v31  ;;  %2851 = vmatprep.mubr.bf16.mxu1 %v2611_v45 }
 0x317   : > { %v2502_v7 = vadd.f32 %v3726_v20, %v5041_v6  ;;  %2852 = vmatmul.mubr.bf16.gmra.mrb[124].mxu1 %v2610_v24  ;;  %v2564_v2 = vmax.f32 %v2500_v26, 0.0 }
 0x318   : > { %v2503_v27 = vadd.f32 %v3727_v1, %v5045_v17  ;;  %v2565_v23 = vmax.f32 %v2501_v52, 0.0 }
 0x319   : > { %v2566_v18 = vmax.f32 %v2502_v7, 0.0 }
 0x31a   : > { %v2567_v11 = vmax.f32 %v2503_v27, 0.0  ;;  %v2323_v56 = vpop.f32.mrb[68].mxu0 }
 0x31b   : > { %v3728_v58 = vadd.f32 %v2323_v56, %v5055_v48  ;;  %v2325_v28 = vpop.f32.mrb[69].mxu0  ;;  %v2612_v33 = vpack.c.bf16 %v2566_v18, %v2564_v2 }
 0x31c   : > { %v3729_v61 = vadd.f32 %v2325_v28, %v5057_v51  ;;  %v2327_v13 = vpop.f32.mrb[70].mxu0  ;;  %v2613_v37 = vpack.c.bf16 %v2567_v11, %v2565_v23 }
 0x31d   : > { %v2504_v31 = vadd.f32 %v3728_v58, %v5041_v6  ;;  %v3730_v14 = vadd.f32 %v2327_v13, %v5059_v54  ;;  %v2329_v3 = vpop.f32.mrb[71].mxu0 }
 0x31e   : > { %v2505_v21 = vadd.f32 %v3729_v61, %v5045_v17  ;;  %v3731_v34 = vadd.f32 %v2329_v3, %v5061_v57  ;;  %2859 = vmatprep.mubr.bf16.mxu1 %v2613_v37 }
 0x31f   : > { %v2506_v22 = vadd.f32 %v3730_v14, %v5041_v6  ;;  %2860 = vmatmul.mubr.bf16.gmra.mrb[128].mxu1 %v2612_v33  ;;  %v2568_v35 = vmax.f32 %v2504_v31, 0.0 }
 0x320   : > { %v2507_v48 = vadd.f32 %v3731_v34, %v5045_v17  ;;  %v2569_v51 = vmax.f32 %v2505_v21, 0.0 }
 0x321   : > { %v2570_v40 = vmax.f32 %v2506_v22, 0.0 }
 0x322   : > { %v2571_v60 = vmax.f32 %v2507_v48, 0.0  ;;  %v2333_v9 = vpop.f32.mrb[72].mxu0 }
 0x323   : > { %v3732_v25 = vadd.f32 %v2333_v9, %v5069_v36  ;;  %v2335_v10 = vpop.f32.mrb[73].mxu0  ;;  %v2614_v54 = vpack.c.bf16 %v2570_v40, %v2568_v35 }
 0x324   : > { %v3733_v24 = vadd.f32 %v2335_v10, %v5071_v41  ;;  %v2337_v62 = vpop.f32.mrb[74].mxu0  ;;  %v2615_v15 = vpack.c.bf16 %v2571_v60, %v2569_v51 }
 0x325   : > { %v2508_v57 = vadd.f32 %v3732_v25, %v5041_v6  ;;  %v3734_v45 = vadd.f32 %v2337_v62, %v5074_v43  ;;  %v2339_v26 = vpop.f32.mrb[75].mxu0 }
 0x326   : > { %v2509_v20 = vadd.f32 %v3733_v24, %v5045_v17  ;;  %v3735_v47 = vadd.f32 %v2339_v26, %v5077_v46  ;;  %2867 = vmatprep.mubr.bf16.mxu1 %v2615_v15 }
 0x327   : > { %v2510_v52 = vadd.f32 %v3734_v45, %v5041_v6  ;;  %2868 = vmatmul.mubr.bf16.gmra.mrb[132].mxu1 %v2614_v54  ;;  %v2572_v1 = vmax.f32 %v2508_v57, 0.0 }
 0x328   : > { %v2511_v36 = vadd.f32 %v3735_v47, %v5045_v17  ;;  %v2573_v41 = vmax.f32 %v2509_v20, 0.0 }
 0x329   : > { %v2574_v7 = vmax.f32 %v2510_v52, 0.0 }
 0x32a   : > { %v2575_v27 = vmax.f32 %v2511_v36, 0.0  ;;  %v2343_v2 = vpop.f32.mrb[76].mxu0 }
 0x32b   : > { %v3736_v18 = vadd.f32 %v2343_v2, %v5085_v8  ;;  %v2345_v23 = vpop.f32.mrb[77].mxu0  ;;  %v2616_v43 = vpack.c.bf16 %v2574_v7, %v2572_v1 }
 0x32c   : > { %v3737_v11 = vadd.f32 %v2345_v23, %v5087_v29  ;;  %v2347_v56 = vpop.f32.mrb[78].mxu0  ;;  %v2617_v58 = vpack.c.bf16 %v2575_v27, %v2573_v41 }
 0x32d   : > { %v2512_v46 = vadd.f32 %v3736_v18, %v5041_v6  ;;  %v3738_v28 = vadd.f32 %v2347_v56, %v5090_v32  ;;  %v2349_v33 = vpop.f32.mrb[79].mxu0 }
 0x32e   : > { %v2513_v61 = vadd.f32 %v3737_v11, %v5045_v17  ;;  %v3739_v13 = vadd.f32 %v2349_v33, %v5093_v16  ;;  %2875 = vmatprep.mubr.bf16.mxu1 %v2617_v58 }
 0x32f   : > { %v2514_v37 = vadd.f32 %v3738_v28, %v5041_v6  ;;  %2876 = vmatmul.mubr.bf16.gmra.mrb[136].mxu1 %v2616_v43  ;;  %v2576_v31 = vmax.f32 %v2512_v46, 0.0 }
 0x330   : > { %v2515_v8 = vadd.f32 %v3739_v13, %v5045_v17  ;;  %v2577_v29 = vmax.f32 %v2513_v61, 0.0 }
 0x331   : > { %v2578_v14 = vmax.f32 %v2514_v37, 0.0 }
 0x332   : > { %v2579_v3 = vmax.f32 %v2515_v8, 0.0  ;;  %v2353_v21 = vpop.f32.mrb[80].mxu0 }
 0x333   : > { %v3740_v34 = vadd.f32 %v2353_v21, %v5101_v39  ;;  %v2355_v22 = vpop.f32.mrb[81].mxu0  ;;  %v2618_v32 = vpack.c.bf16 %v2578_v14, %v2576_v31 }
 0x334   : > { %v3741_v48 = vadd.f32 %v2355_v22, %v5103_v49  ;;  %v2357_v35 = vpop.f32.mrb[82].mxu0  ;;  %v2619_v40 = vpack.c.bf16 %v2579_v3, %v2577_v29 }
 0x335   : > { %v2516_v16 = vadd.f32 %v3740_v34, %v5041_v6  ;;  %v3742_v51 = vadd.f32 %v2357_v35, %v5106_v55  ;;  %v2359_v60 = vpop.f32.mrb[83].mxu0 }
 0x336   : > { %v2517_v9 = vadd.f32 %v3741_v48, %v5045_v17  ;;  %v3743_v25 = vadd.f32 %v2359_v60, %v5109_v4  ;;  %2883 = vmatprep.mubr.bf16.mxu1 %v2619_v40 }
 0x337   : > { %v2518_v10 = vadd.f32 %v3742_v51, %v5041_v6  ;;  %2884 = vmatmul.mubr.bf16.gmra.mrb[140].mxu1 %v2618_v32  ;;  %v2580_v54 = vmax.f32 %v2516_v16, 0.0 }
 0x338   : > { %v2519_v39 = vadd.f32 %v3743_v25, %v5045_v17  ;;  %v2581_v49 = vmax.f32 %v2517_v9, 0.0 }
 0x339   : > { %v2582_v24 = vmax.f32 %v2518_v10, 0.0 }
 0x33a   : > { %v2583_v62 = vmax.f32 %v2519_v39, 0.0  ;;  %v2363_v15 = vpop.f32.mrb[84].mxu0 }
 0x33b   : > { %v3744_v57 = vadd.f32 %v2363_v15, %v5117_v38  ;;  %v2365_v45 = vpop.f32.mrb[85].mxu0  ;;  %v2620_v55 = vpack.c.bf16 %v2582_v24, %v2580_v54 }
 0x33c   : > { %v3745_v26 = vadd.f32 %v2365_v45, %v5119_v42  ;;  %v2367_v20 = vpop.f32.mrb[86].mxu0  ;;  %v2621_v47 = vpack.c.bf16 %v2583_v62, %v2581_v49 }
 0x33d   : > { %v2520_v4 = vadd.f32 %v3744_v57, %v5041_v6  ;;  %v3746_v52 = vadd.f32 %v2367_v20, %v5122_v44  ;;  %v2369_v36 = vpop.f32.mrb[87].mxu0 }
 0x33e   : > { %v2521_v1 = vadd.f32 %v3745_v26, %v5045_v17  ;;  %v3747_v7 = vadd.f32 %v2369_v36, %v5125_v63  ;;  %2891 = vmatprep.mubr.bf16.mxu1 %v2621_v47 }
 0x33f   : > { %v2522_v41 = vadd.f32 %v3746_v52, %v5041_v6  ;;  %2892 = vmatmul.mubr.bf16.gmra.mrb[144].mxu1 %v2620_v55  ;;  %v2584_v27 = vmax.f32 %v2520_v4, 0.0 }
 0x340   : > { %v2523_v38 = vadd.f32 %v3747_v7, %v5045_v17  ;;  %v2585_v42 = vmax.f32 %v2521_v1, 0.0 }
 0x341   : > { %v2586_v2 = vmax.f32 %v2522_v41, 0.0 }
 0x342   : > { %v2587_v18 = vmax.f32 %v2523_v38, 0.0  ;;  %v2373_v23 = vpop.f32.mrb[88].mxu0 }
 0x343   : > { %v3748_v43 = vadd.f32 %v2373_v23, %v5133_v0  ;;  %v2375_v11 = vpop.f32.mrb[89].mxu0  ;;  %v2622_v44 = vpack.c.bf16 %v2586_v2, %v2584_v27 }
 0x344   : > { %v3749_v56 = vadd.f32 %v2375_v11, %v5135_v30  ;;  %v2377_v58 = vpop.f32.mrb[90].mxu0  ;;  %v2623_v46 = vpack.c.bf16 %v2587_v18, %v2585_v42 }
 0x345   : > { %v2524_v63 = vadd.f32 %v3748_v43, %v5041_v6  ;;  %v3750_v28 = vadd.f32 %v2377_v58, %v5138_v59  ;;  %v2379_v33 = vpop.f32.mrb[91].mxu0 }
 0x346   : > { %v2525_v61 = vadd.f32 %v3749_v56, %v5045_v17  ;;  %v3751_v13 = vadd.f32 %v2379_v33, %v5141_v5  ;;  %2899 = vmatprep.mubr.bf16.mxu1 %v2623_v46 }
 0x347   : > { %v2526_v37 = vadd.f32 %v3750_v28, %v5041_v6  ;;  %2900 = vmatmul.mubr.bf16.gmra.mrb[148].mxu1 %v2622_v44  ;;  %v2588_v8 = vmax.f32 %v2524_v63, 0.0 }
 0x348   : > { %v2527_v0 = vadd.f32 %v3751_v13, %v5045_v17  ;;  %v2589_v30 = vmax.f32 %v2525_v61, 0.0 }
 0x349   : > { %v2590_v31 = vmax.f32 %v2526_v37, 0.0 }
 0x34a   : > { %v2591_v14 = vmax.f32 %v2527_v0, 0.0  ;;  %v2383_v29 = vpop.f32.mrb[92].mxu0 }
 0x34b   : > { %v3752_v3 = vadd.f32 %v2383_v29, %v5149_v50  ;;  %v2385_v21 = vpop.f32.mrb[93].mxu0  ;;  %v2624_v59 = vpack.c.bf16 %v2590_v31, %v2588_v8 }
 0x34c   : > { %v3753_v34 = vadd.f32 %v2385_v21, %v5151_v53  ;;  %v2387_v22 = vpop.f32.mrb[94].mxu0  ;;  %v2625_v32 = vpack.c.bf16 %v2591_v14, %v2589_v30 }
 0x34d   : > { %v2528_v5 = vadd.f32 %v3752_v3, %v5041_v6  ;;  %v3754_v48 = vadd.f32 %v2387_v22, %v5154_v19  ;;  %v2389_v35 = vpop.f32.mrb[95].mxu0 }
 0x34e   : > { %v2529_v40 = vadd.f32 %v3753_v34, %v5045_v17  ;;  %v3755_v16 = vadd.f32 %v2389_v35, %v5157_v12  ;;  %2907 = vmatprep.mubr.bf16.mxu1 %v2625_v32 }
 0x34f   : > { %v2530_v51 = vadd.f32 %v3754_v48, %v5041_v6  ;;  %2908 = vmatmul.mubr.bf16.gmra.mrb[152].mxu1 %v2624_v59  ;;  %v2592_v53 = vmax.f32 %v2528_v5, 0.0  ;;  %v5233_v6 = vld [vmem:[%s5347_s8] ss:$0 sm:$0xff] }
 0x350   : > { %v2531_v50 = vadd.f32 %v3755_v16, %v5045_v17  ;;  %v2593_v9 = vmax.f32 %v2529_v40, 0.0 }
 0x351   : > { %v2594_v60 = vmax.f32 %v2530_v51, 0.0 }
 0x352   : > { %v2595_v25 = vmax.f32 %v2531_v50, 0.0 }
 0x353   : > { %v2626_v10 = vpack.c.bf16 %v2594_v60, %v2592_v53 }
 0x354   : > { %v2627_v39 = vpack.c.bf16 %v2595_v25, %v2593_v9 }
 0x356   : > { %2915 = vmatprep.mubr.bf16.mxu1 %v2627_v39 }
 0x357   : > { %2916 = vmatmul.mubr.bf16.gmra.mrb[156].mxu1 %v2626_v10 }
 0x3b2   : > { %v3516_v19 = vpop.f32.mrb[96].mxu1 }
 0x3b3   : > { %v3517_v54 = vpop.f32.mrb[97].mxu1 }
 0x3b4   : > { %v3518_v24 = vadd.f32 %v3517_v54, %v3516_v19  ;;  %v3519_v12 = vpop.f32.mrb[98].mxu1 }
 0x3b5   : > { %v3520_v17 = vpop.f32.mrb[99].mxu1 }
 0x3b6   : > { %v3521_v49 = vadd.f32 %v3520_v17, %v3519_v12  ;;  %v2798_v62 = vadd.f32 %v3518_v24, %v5233_v6 }
 0x3b8   : > { %v2801_v15 = vadd.f32 %v3521_v49, %v5233_v6 }
 0x3ba   : > { %v3368_v57 = vpack.c.bf16 %v2801_v15, %v2798_v62  ;;  %v3522_v45 = vpop.f32.mrb[100].mxu1 }
 0x3bb   : > { %v3523_v55 = vpop.f32.mrb[101].mxu1 }
 0x3bc   : > { %3369 = vst [vmem:[%s5239_s25] sm:$0xff] %v3368_v57   ;;  %v3524_v26 = vadd.f32 %v3523_v55, %v3522_v45  ;;  %v3525_v20 = vpop.f32.mrb[102].mxu1 }
 0x3bd   : > { %v3526_v47 = vpop.f32.mrb[103].mxu1 }
 0x3be   : > { %v3527_v4 = vadd.f32 %v3526_v47, %v3525_v20  ;;  %v2806_v52 = vadd.f32 %v3524_v26, %v5233_v6 }
 0x3c0   : > { %v2809_v36 = vadd.f32 %v3527_v4, %v5233_v6 }
 0x3c2   : > { %v3373_v1 = vpack.c.bf16 %v2809_v36, %v2806_v52  ;;  %v3528_v7 = vpop.f32.mrb[104].mxu1 }
 0x3c3   : > { %v3529_v41 = vpop.f32.mrb[105].mxu1 }
 0x3c4   : > { %3445 = vst [vmem:[%s5239_s25 + $0x8] sm:$0xff] %v3373_v1   ;;  %v3530_v38 = vadd.f32 %v3529_v41, %v3528_v7  ;;  %v3531_v27 = vpop.f32.mrb[106].mxu1 }
 0x3c5   : > { %v3532_v2 = vpop.f32.mrb[107].mxu1 }
 0x3c6   : > { %v3533_v42 = vadd.f32 %v3532_v2, %v3531_v27  ;;  %v2814_v18 = vadd.f32 %v3530_v38, %v5233_v6 }
 0x3c8   : > { %v2817_v23 = vadd.f32 %v3533_v42, %v5233_v6 }
 0x3ca   : > { %v3378_v43 = vpack.c.bf16 %v2817_v23, %v2814_v18  ;;  %v3534_v11 = vpop.f32.mrb[108].mxu1 }
 0x3cb   : > { %v3535_v44 = vpop.f32.mrb[109].mxu1 }
 0x3cc   : > { %3446 = vst [vmem:[%s5239_s25 + $0x10] sm:$0xff] %v3378_v43   ;;  %v3536_v56 = vadd.f32 %v3535_v44, %v3534_v11  ;;  %v3537_v58 = vpop.f32.mrb[110].mxu1 }
 0x3cd   : > { %v3538_v46 = vpop.f32.mrb[111].mxu1 }
 0x3ce   : > { %v3539_v63 = vadd.f32 %v3538_v46, %v3537_v58  ;;  %v2822_v28 = vadd.f32 %v3536_v56, %v5233_v6 }
 0x3d0   : > { %v2825_v33 = vadd.f32 %v3539_v63, %v5233_v6 }
 0x3d2   : > { %v3383_v61 = vpack.c.bf16 %v2825_v33, %v2822_v28  ;;  %v3540_v13 = vpop.f32.mrb[112].mxu1 }
 0x3d3   : > { %v3541_v37 = vpop.f32.mrb[113].mxu1 }
 0x3d4   : > { %3447 = vst [vmem:[%s5239_s25 + $0x18] sm:$0xff] %v3383_v61   ;;  %v3542_v0 = vadd.f32 %v3541_v37, %v3540_v13  ;;  %v3543_v8 = vpop.f32.mrb[114].mxu1 }
 0x3d5   : > { %v3544_v31 = vpop.f32.mrb[115].mxu1 }
 0x3d6   : > { %v3545_v30 = vadd.f32 %v3544_v31, %v3543_v8  ;;  %v2830_v14 = vadd.f32 %v3542_v0, %v5233_v6 }
 0x3d8   : > { %v2833_v29 = vadd.f32 %v3545_v30, %v5233_v6 }
 0x3da   : > { %v3388_v3 = vpack.c.bf16 %v2833_v29, %v2830_v14  ;;  %v3546_v21 = vpop.f32.mrb[116].mxu1 }
 0x3db   : > { %v3547_v59 = vpop.f32.mrb[117].mxu1 }
 0x3dc   : > { %3448 = vst [vmem:[%s5239_s25 + $0x20] sm:$0xff] %v3388_v3   ;;  %v3548_v34 = vadd.f32 %v3547_v59, %v3546_v21  ;;  %v3549_v22 = vpop.f32.mrb[118].mxu1 }
 0x3dd   : > { %v3550_v32 = vpop.f32.mrb[119].mxu1 }
 0x3de   : > { %v3551_v5 = vadd.f32 %v3550_v32, %v3549_v22  ;;  %v2838_v48 = vadd.f32 %v3548_v34, %v5233_v6 }
 0x3e0   : > { %v2841_v35 = vadd.f32 %v3551_v5, %v5233_v6 }
 0x3e2   : > { %v3393_v40 = vpack.c.bf16 %v2841_v35, %v2838_v48  ;;  %v3552_v16 = vpop.f32.mrb[120].mxu1 }
 0x3e3   : > { %v3553_v51 = vpop.f32.mrb[121].mxu1 }
 0x3e4   : > { %3449 = vst [vmem:[%s5239_s25 + $0x28] sm:$0xff] %v3393_v40   ;;  %v3554_v50 = vadd.f32 %v3553_v51, %v3552_v16  ;;  %v3555_v53 = vpop.f32.mrb[122].mxu1 }
 0x3e5   : > { %v3556_v60 = vpop.f32.mrb[123].mxu1 }
 0x3e6   : > { %v3557_v9 = vadd.f32 %v3556_v60, %v3555_v53  ;;  %v2846_v25 = vadd.f32 %v3554_v50, %v5233_v6 }
 0x3e8   : > { %v2849_v10 = vadd.f32 %v3557_v9, %v5233_v6 }
 0x3ea   : > { %v3398_v39 = vpack.c.bf16 %v2849_v10, %v2846_v25  ;;  %v3558_v19 = vpop.f32.mrb[124].mxu1 }
 0x3eb   : > { %v3559_v54 = vpop.f32.mrb[125].mxu1 }
 0x3ec   : > { %3450 = vst [vmem:[%s5239_s25 + $0x30] sm:$0xff] %v3398_v39   ;;  %v3560_v24 = vadd.f32 %v3559_v54, %v3558_v19  ;;  %v3561_v12 = vpop.f32.mrb[126].mxu1 }
 0x3ed   : > { %v3562_v17 = vpop.f32.mrb[127].mxu1 }
 0x3ee   : > { %v3563_v49 = vadd.f32 %v3562_v17, %v3561_v12  ;;  %v2854_v62 = vadd.f32 %v3560_v24, %v5233_v6 }
 0x3f0   : > { %v2857_v15 = vadd.f32 %v3563_v49, %v5233_v6 }
 0x3f2   : > { %v3403_v57 = vpack.c.bf16 %v2857_v15, %v2854_v62  ;;  %v3564_v45 = vpop.f32.mrb[128].mxu1 }
 0x3f3   : > { %v3565_v55 = vpop.f32.mrb[129].mxu1 }
 0x3f4   : > { %3451 = vst [vmem:[%s5239_s25 + $0x38] sm:$0xff] %v3403_v57   ;;  %v3566_v26 = vadd.f32 %v3565_v55, %v3564_v45  ;;  %v3567_v20 = vpop.f32.mrb[130].mxu1 }
 0x3f5   : > { %v3568_v47 = vpop.f32.mrb[131].mxu1 }
 0x3f6   : > { %v3569_v4 = vadd.f32 %v3568_v47, %v3567_v20  ;;  %v2862_v52 = vadd.f32 %v3566_v26, %v5233_v6 }
 0x3f8   : > { %v2865_v36 = vadd.f32 %v3569_v4, %v5233_v6 }
 0x3fa   : > { %v3408_v1 = vpack.c.bf16 %v2865_v36, %v2862_v52  ;;  %v3570_v7 = vpop.f32.mrb[132].mxu1 }
 0x3fb   : > { %v3571_v41 = vpop.f32.mrb[133].mxu1 }
 0x3fc   : > { %3452 = vst [vmem:[%s5239_s25 + $0x40] sm:$0xff] %v3408_v1   ;;  %v3572_v38 = vadd.f32 %v3571_v41, %v3570_v7  ;;  %v3573_v27 = vpop.f32.mrb[134].mxu1 }
 0x3fd   : > { %v3574_v2 = vpop.f32.mrb[135].mxu1 }
 0x3fe   : > { %v3575_v42 = vadd.f32 %v3574_v2, %v3573_v27  ;;  %v2870_v18 = vadd.f32 %v3572_v38, %v5233_v6 }
 0x400   : > { %v2873_v23 = vadd.f32 %v3575_v42, %v5233_v6 }
 0x402   : > { %v3413_v43 = vpack.c.bf16 %v2873_v23, %v2870_v18  ;;  %v3576_v11 = vpop.f32.mrb[136].mxu1 }
 0x403   : > { %v3577_v44 = vpop.f32.mrb[137].mxu1 }
 0x404   : > { %3453 = vst [vmem:[%s5239_s25 + $0x48] sm:$0xff] %v3413_v43   ;;  %v3578_v56 = vadd.f32 %v3577_v44, %v3576_v11  ;;  %v3579_v58 = vpop.f32.mrb[138].mxu1 }
 0x405   : > { %v3580_v46 = vpop.f32.mrb[139].mxu1 }
 0x406   : > { %v3581_v63 = vadd.f32 %v3580_v46, %v3579_v58  ;;  %v2878_v28 = vadd.f32 %v3578_v56, %v5233_v6 }
 0x408   : > { %v2881_v33 = vadd.f32 %v3581_v63, %v5233_v6 }
 0x40a   : > { %v3418_v61 = vpack.c.bf16 %v2881_v33, %v2878_v28  ;;  %v3582_v13 = vpop.f32.mrb[140].mxu1 }
 0x40b   : > { %v3583_v37 = vpop.f32.mrb[141].mxu1 }
 0x40c   : > { %3454 = vst [vmem:[%s5239_s25 + $0x50] sm:$0xff] %v3418_v61   ;;  %v3584_v0 = vadd.f32 %v3583_v37, %v3582_v13  ;;  %v3585_v8 = vpop.f32.mrb[142].mxu1 }
 0x40d   : > { %v3586_v31 = vpop.f32.mrb[143].mxu1 }
 0x40e   : > { %v3587_v30 = vadd.f32 %v3586_v31, %v3585_v8  ;;  %v2886_v14 = vadd.f32 %v3584_v0, %v5233_v6 }
 0x410   : > { %v2889_v29 = vadd.f32 %v3587_v30, %v5233_v6 }
 0x412   : > { %v3423_v3 = vpack.c.bf16 %v2889_v29, %v2886_v14  ;;  %v3588_v21 = vpop.f32.mrb[144].mxu1 }
 0x413   : > { %v3589_v59 = vpop.f32.mrb[145].mxu1 }
 0x414   : > { %3455 = vst [vmem:[%s5239_s25 + $0x58] sm:$0xff] %v3423_v3   ;;  %v3590_v34 = vadd.f32 %v3589_v59, %v3588_v21  ;;  %v3591_v22 = vpop.f32.mrb[146].mxu1 }
 0x415   : > { %v3592_v32 = vpop.f32.mrb[147].mxu1 }
 0x416   : > { %v3593_v5 = vadd.f32 %v3592_v32, %v3591_v22  ;;  %v2894_v48 = vadd.f32 %v3590_v34, %v5233_v6 }
 0x418   : > { %v2897_v35 = vadd.f32 %v3593_v5, %v5233_v6 }
 0x41a   : > { %v3428_v40 = vpack.c.bf16 %v2897_v35, %v2894_v48  ;;  %v3594_v16 = vpop.f32.mrb[148].mxu1 }
 0x41b   : > { %v3595_v51 = vpop.f32.mrb[149].mxu1 }
 0x41c   : > { %3456 = vst [vmem:[%s5239_s25 + $0x60] sm:$0xff] %v3428_v40   ;;  %v3596_v50 = vadd.f32 %v3595_v51, %v3594_v16  ;;  %v3597_v53 = vpop.f32.mrb[150].mxu1 }
 0x41d   : > { %v3598_v60 = vpop.f32.mrb[151].mxu1 }
 0x41e   : > { %v3599_v9 = vadd.f32 %v3598_v60, %v3597_v53  ;;  %v2902_v25 = vadd.f32 %v3596_v50, %v5233_v6 }
 0x420   : > { %v2905_v10 = vadd.f32 %v3599_v9, %v5233_v6 }
 0x422   : > { %v3433_v39 = vpack.c.bf16 %v2905_v10, %v2902_v25  ;;  %v3600_v19 = vpop.f32.mrb[152].mxu1 }
 0x423   : > { %v3601_v54 = vpop.f32.mrb[153].mxu1 }
 0x424   : > { %3457 = vst [vmem:[%s5239_s25 + $0x68] sm:$0xff] %v3433_v39   ;;  %v3602_v24 = vadd.f32 %v3601_v54, %v3600_v19  ;;  %v3603_v12 = vpop.f32.mrb[154].mxu1 }
 0x425   : > { %v3604_v17 = vpop.f32.mrb[155].mxu1 }
 0x426   : > { %v3605_v49 = vadd.f32 %v3604_v17, %v3603_v12  ;;  %v2910_v62 = vadd.f32 %v3602_v24, %v5233_v6 }
 0x428   : > { %v2913_v15 = vadd.f32 %v3605_v49, %v5233_v6 }
 0x42a   : > { %v3438_v57 = vpack.c.bf16 %v2913_v15, %v2910_v62  ;;  %v3606_v45 = vpop.f32.mrb[156].mxu1 }
 0x42b   : > { %v3607_v55 = vpop.f32.mrb[157].mxu1 }
 0x42c   : > { %3458 = vst [vmem:[%s5239_s25 + $0x70] sm:$0xff] %v3438_v57   ;;  %v3608_v26 = vadd.f32 %v3607_v55, %v3606_v45  ;;  %v3609_v20 = vpop.f32.mrb[158].mxu1 }
 0x42d   : > { %v3610_v47 = vpop.f32.mrb[159].mxu1 }
 0x42e   : > { %v3611_v4 = vadd.f32 %v3610_v47, %v3609_v20  ;;  %v2918_v52 = vadd.f32 %v3608_v26, %v5233_v6 }
 0x430   : > { %v2921_v36 = vadd.f32 %v3611_v4, %v5233_v6 }
 0x432   : > { %v3443_v1 = vpack.c.bf16 %v2921_v36, %v2918_v52 }
 0x434   : > { %3459 = vst [vmem:[%s5239_s25 + $0x78] sm:$0xff] %v3443_v1  }
 0x435   : > { %3915 = shalt.err (!%p3912_p3)
}
 0x436   : > { %s3916_s21 = scalar_lea.hbm %s5291_s14, 2048  ;;  %s3920_s26 = scalar_lea.hbm %s5348_s9, 4096 }
 0x437   : > { %p3917_p4 = scmp.ne.s32.totalorder %s5291_s14, %s3916_s21  ;;  %p3921_p9 = scmp.lt.u32.totalorder %s5291_s14, %s5348_s9 }
 0x438   : > { %p3922_p10 = scmp.lt.u32.totalorder %s3920_s26, %s3916_s21  ;;  %p3924_p12 = scmp.lt.u32.totalorder %s3916_s21, %s5291_s14 }
 0x439   : > { %p3918_p7 = pnand %p3917_p4, %p4059_p5 }
 0x43a   : > { %p3923_p11 = por %p3922_p10, %p3921_p9 }
 0x43b   : > { %p3919_p8 = pneg %p3918_p7 }
 0x43c   : > { %p3925_p13 = por %p3924_p12, %p3923_p11 }
 0x43e   : > { %p3926_p0 = pnand %p3925_p13, %p3919_p8 }
 0x440   : > { %3929 = shalt.err (!%p3926_p0)
}
 0x441   : > { %s3969_s13 = smov 64   ;;  %s3970_s17 = smov 4  }
 0x442   : > { %3820 = dma.vmem_to_hbm [thread:$0]  (%p4059_p5), %s5293_s27, 2048, %s5291_s14, %s5298_s16, %s3969_s13, %s3969_s13, %s3970_s17  }
 0x443 PF: > { %p3826_p1 = scmp.ge.s32.totalorder %s3964_s12, 2  ;;  %s3113_s22 = sand.u32 1, %s3952_s30  }
 0x444   : > { %s3114_s23 = scalar_lea.sflag [#allocation3], %s3113_s22 }
 0x445   : > { %p3823_p2 = pnand %p3826_p1, %p4063_p6 }
 0x447   : > { %3947 = dma.done.wait (!%p3823_p2), %s3114_s23, 2048  }
 0x448   : > { %3949 = vsyncadd (!%p3823_p2), %s3114_s23, 4294965248  ;;  %p19_p3 = scmp.ge.s32.totalorder %s4046_s15, 4   ;;  %s5420_s30 = smov %s3956_s10 }
 0x449   : > { %s5421_s10 = smov %s3960_s11  ;;  %s5422_s11 = smov %s4057_s18 }
 0x44a   : > { %s5423_s12 = smov %s4046_s15  ;;  %21 = sbr.rel (!%p19_p3) target bundleno = 3 (0x3), region = 94 }
 0x451   :  { %3119 = vsyncpa [#allocation3], 1 }
 0x452   :  { %3121 = vsyncpa [#allocation3 + $0x1], 1 }

</bundles_post_ra>
